<compile_context>
chip_gen: v5e
topology: v5e:2x2
jax: 0.10.0
libtpu: 0.0.40
codegen_flags: <defaults>
</compile_context>

<pallas_src>
import functools

import jax
import jax.numpy as jnp
from jax.experimental import pallas as pl
from jax.experimental.pallas import tpu as pltpu

IN_FEATURES = 784   # kept unpadded: full-dim blocks are exempt from the 128 rule
HIDDEN = 512
OUT_FEATURES = 10
N_PAD = 128         # lane-dense output slab; real logits live in [:, :10]


def mlp_kernel(x_ref, w1_ref, b1_ref, w2_ref, b2_ref, o_ref):
    # Fused fc1 + bias + ReLU + fc2, all in VMEM. x arrives f32; cast to bf16
    # in-kernel (cheap VPU work overlapped with the MXU).
    x = x_ref[...].astype(jnp.bfloat16)                                  # (TM, 784)
    h = jnp.dot(x, w1_ref[...], preferred_element_type=jnp.float32)      # (TM, 512) f32
    h = jnp.maximum(h + b1_ref[...], 0.0)                                # bias + ReLU
    y = jnp.dot(h.astype(jnp.bfloat16), w2_ref[...],
                preferred_element_type=jnp.float32)                      # (TM, 128) f32
    o_ref[...] = (y + b2_ref[...]).astype(o_ref.dtype)                   # bf16 store


def _choose_tiling(batch):
    """Batch-adaptive tiling: pad only to the 16-row granule; prefer >=2 grid steps."""
    granule = 16                                   # bf16 output sublane granule
    b_pad = pl.cdiv(batch, granule) * granule
    tm = min(512, b_pad)                           # big tiles amortize step overhead
    if b_pad >= 2 * granule:
        # Guarantee at least 2 grid steps so v7x's second TensorCore is not idle.
        tm = min(tm, pl.cdiv(b_pad // 2, granule) * granule)
    b_pad = pl.cdiv(b_pad, tm) * tm                # make tm divide b_pad
    return b_pad, tm


@functools.partial(jax.jit, static_argnames=("b_pad", "tm"))
def _mlp_forward_impl(x, w1, b1, w2, b2, *, b_pad, tm):
    B = x.shape[0]

    # Only batch padding for x (zeros); no K padding, no dtype change (cast in-kernel).
    if b_pad > B:
        x = jnp.pad(x, ((0, b_pad - B), (0, 0)))
    x = x.astype(jnp.float32)

    # One-time, tiny weight prep: bf16 weights, f32 biases, lane-padded output cols.
    w1p = w1.astype(jnp.bfloat16)                                        # (784, 512)
    w2p = jnp.pad(w2, ((0, 0), (0, N_PAD - OUT_FEATURES))).astype(jnp.bfloat16)
    b1p = b1.reshape(1, -1).astype(jnp.float32)                          # (1, 512)
    b2p = jnp.pad(b2.reshape(1, -1),
                  ((0, 0), (0, N_PAD - OUT_FEATURES))).astype(jnp.float32)

    out = pl.pallas_call(
        mlp_kernel,
        out_shape=jax.ShapeDtypeStruct((b_pad, N_PAD), jnp.bfloat16),
        grid_spec=pltpu.PrefetchScalarGridSpec(
            num_scalar_prefetch=0,
            grid=(b_pad // tm,),
            in_specs=[
                pl.BlockSpec((tm, IN_FEATURES), lambda i: (i, 0)),       # x: streamed
                pl.BlockSpec((IN_FEATURES, HIDDEN), lambda i: (0, 0)),   # W1: resident
                pl.BlockSpec((1, HIDDEN), lambda i: (0, 0)),             # b1: resident
                pl.BlockSpec((HIDDEN, N_PAD), lambda i: (0, 0)),         # W2: resident
                pl.BlockSpec((1, N_PAD), lambda i: (0, 0)),              # b2: resident
            ],
            out_specs=pl.BlockSpec((tm, N_PAD), lambda i: (i, 0)),
        ),
        compiler_params=pltpu.CompilerParams(
            dimension_semantics=("parallel",),   # v7x: shard batch tiles across 2 TCs
            vmem_limit_bytes=32 << 20,           # ~6 MiB working set at tm=512
        ),
    )(x, w1p, b1p, w2p, b2p)

    # Strip batch padding and the lane-padded logit columns.
    return out[:B, :OUT_FEATURES]


def mlp_forward(x, w1, b1, w2, b2):
    """x: (B, 784) f32; w1: (784, 512); b1: (1, 512); w2: (512, 10); b2: (1, 10).
    Returns bf16 logits of shape (B, 10)."""
    b_pad, tm = _choose_tiling(x.shape[0])
    return _mlp_forward_impl(x, w1, b1, w2, b2, b_pad=b_pad, tm=tm)


def init_params(key):
    """Deterministic init mimicking PyTorch nn.Linear (uniform +/- 1/sqrt(fan_in))."""
    k1, k2, k3, k4 = jax.random.split(key, 4)
    bound1 = 1.0 / (IN_FEATURES ** 0.5)
    bound2 = 1.0 / (HIDDEN ** 0.5)
    # Stored as (in, out) == PyTorch weight.T so the kernel computes x @ W.
    w1 = jax.random.uniform(k1, (IN_FEATURES, HIDDEN), jnp.float32, -bound1, bound1)
    b1 = jax.random.uniform(k2, (1, HIDDEN), jnp.float32, -bound1, bound1)
    w2 = jax.random.uniform(k3, (HIDDEN, OUT_FEATURES), jnp.float32, -bound2, bound2)
    b2 = jax.random.uniform(k4, (1, OUT_FEATURES), jnp.float32, -bound2, bound2)
    return w1, b1, w2, b2


if __name__ == "__main__":
    key = jax.random.PRNGKey(0)
    kx, kp = jax.random.split(key)

    B = 8  # small batch of flattened MNIST images
    x = jax.random.normal(kx, (B, IN_FEATURES), jnp.float32)
    w1, b1, w2, b2 = init_params(kp)

    out = mlp_forward(x, w1, b1, w2, b2)
    out = jax.block_until_ready(out)
    assert out.shape == (B, OUT_FEATURES)
    out_f32 = out.astype(jnp.float32)

    # Reference on the same bf16-weights / f32-accumulate path (kernel rounds once to bf16).
    h_ref = jnp.maximum(
        jnp.dot(x.astype(jnp.bfloat16), w1.astype(jnp.bfloat16),
                preferred_element_type=jnp.float32) + b1, 0.0)
    ref = jnp.dot(h_ref.astype(jnp.bfloat16), w2.astype(jnp.bfloat16),
                  preferred_element_type=jnp.float32) + b2
    assert jnp.allclose(out_f32, ref, atol=3e-2, rtol=3e-2)

    # Sanity vs. pure f32 reference (loose tolerance for bf16 weights / bf16 output).
    ref_f32 = jnp.maximum(x @ w1 + b1, 0.0) @ w2 + b2
    assert jnp.allclose(out_f32, ref_f32, atol=1e-1, rtol=1e-1)

    print("KERNEL_OK")
</pallas_src>

<mosaic_0001>
module attributes {stable_mosaic.version = 11 : i64} {
  func.func @mlp_kernel(%arg0: i32, %arg1: memref<16x784xf32, #tpu.memory_space<vmem>>, %arg2: memref<784x512xbf16, #tpu.memory_space<vmem>>, %arg3: memref<1x512xf32, #tpu.memory_space<vmem>>, %arg4: memref<512x128xbf16, #tpu.memory_space<vmem>>, %arg5: memref<1x128xf32, #tpu.memory_space<vmem>>, %arg6: memref<16x128xbf16, #tpu.memory_space<vmem>>) attributes {dimension_semantics = [#tpu.dimension_semantics<parallel>], iteration_bounds = array<i64: 1>, scalar_prefetch = 0 : i64, scratch_operands = 0 : i64, tpu.core_type = #tpu.core_type<tc>, window_params = [{transform_indices = @transform_0, window_bounds = array<i64: 16, 784>}, {pipeline_mode = #tpu.pipeline_mode<synchronous>, transform_indices = @transform_1, window_bounds = array<i64: 784, 512>}, {pipeline_mode = #tpu.pipeline_mode<synchronous>, transform_indices = @transform_2, window_bounds = array<i64: 1, 512>}, {pipeline_mode = #tpu.pipeline_mode<synchronous>, transform_indices = @transform_3, window_bounds = array<i64: 512, 128>}, {pipeline_mode = #tpu.pipeline_mode<synchronous>, transform_indices = @transform_4, window_bounds = array<i64: 1, 128>}, {transform_indices = @transform_5, window_bounds = array<i64: 16, 128>}]} {
    %c0 = arith.constant 0 : index
    %c0_0 = arith.constant 0 : index
    %0 = vector.load %arg1[%c0, %c0_0] : memref<16x784xf32, #tpu.memory_space<vmem>>, vector<16x784xf32>
    %1 = arith.truncf %0 : vector<16x784xf32> to vector<16x784xbf16>
    %c0_1 = arith.constant 0 : index
    %c0_2 = arith.constant 0 : index
    %2 = vector.load %arg2[%c0_1, %c0_2] : memref<784x512xbf16, #tpu.memory_space<vmem>>, vector<784x512xbf16>
    %cst = arith.constant dense<0.000000e+00> : vector<16x512xf32>
    %3 = tpu.matmul %1, %2, %cst {dimension_numbers = #tpu.dot_dimension_numbers<[1], [0], [0], [1], [0, 0, 1, 1], [], []>} : vector<16x784xbf16>, vector<784x512xbf16>, vector<16x512xf32> -> vector<16x512xf32>
    %c0_3 = arith.constant 0 : index
    %c0_4 = arith.constant 0 : index
    %4 = vector.load %arg3[%c0_3, %c0_4] : memref<1x512xf32, #tpu.memory_space<vmem>>, vector<1x512xf32>
    %5 = vector.broadcast %4 : vector<1x512xf32> to vector<16x512xf32>
    %6 = arith.addf %3, %5 : vector<16x512xf32>
    %cst_5 = arith.constant 0.000000e+00 : f32
    %7 = vector.broadcast %cst_5 : f32 to vector<16x512xf32>
    %8 = arith.maximumf %6, %7 : vector<16x512xf32>
    %9 = arith.truncf %8 : vector<16x512xf32> to vector<16x512xbf16>
    %c0_6 = arith.constant 0 : index
    %c0_7 = arith.constant 0 : index
    %10 = vector.load %arg4[%c0_6, %c0_7] : memref<512x128xbf16, #tpu.memory_space<vmem>>, vector<512x128xbf16>
    %cst_8 = arith.constant dense<0.000000e+00> : vector<16x128xf32>
    %11 = tpu.matmul %9, %10, %cst_8 {dimension_numbers = #tpu.dot_dimension_numbers<[1], [0], [0], [1], [0, 0, 1, 1], [], []>} : vector<16x512xbf16>, vector<512x128xbf16>, vector<16x128xf32> -> vector<16x128xf32>
    %c0_9 = arith.constant 0 : index
    %c0_10 = arith.constant 0 : index
    %12 = vector.load %arg5[%c0_9, %c0_10] : memref<1x128xf32, #tpu.memory_space<vmem>>, vector<1x128xf32>
    %13 = vector.broadcast %12 : vector<1x128xf32> to vector<16x128xf32>
    %14 = arith.addf %11, %13 : vector<16x128xf32>
    %15 = arith.truncf %14 : vector<16x128xf32> to vector<16x128xbf16>
    %c0_11 = arith.constant 0 : index
    %c0_12 = arith.constant 0 : index
    %16 = vector.load %arg6[%c0_11, %c0_12] : memref<16x128xbf16, #tpu.memory_space<vmem>>, vector<16x128xbf16>
    tpu.vector_store %arg6[%c0_11, %c0_12], %15 {strides = array<i32>} : memref<16x128xbf16, #tpu.memory_space<vmem>>, vector<16x128xbf16>,
    return
  }
  func.func @transform_0(%arg0: i32) -> (i32, i32) {
    %c0_i32 = arith.constant 0 : i32
    %c0_i32_0 = arith.constant 0 : i32
    return %arg0, %c0_i32 : i32, i32
  }
  func.func @transform_1(%arg0: i32) -> (i32, i32) {
    %c0_i32 = arith.constant 0 : i32
    %c0_i32_0 = arith.constant 0 : i32
    %c0_i32_1 = arith.constant 0 : i32
    return %c0_i32, %c0_i32_0 : i32, i32
  }
  func.func @transform_2(%arg0: i32) -> (i32, i32) {
    %c0_i32 = arith.constant 0 : i32
    %c0_i32_0 = arith.constant 0 : i32
    %c0_i32_1 = arith.constant 0 : i32
    return %c0_i32, %c0_i32_0 : i32, i32
  }
  func.func @transform_3(%arg0: i32) -> (i32, i32) {
    %c0_i32 = arith.constant 0 : i32
    %c0_i32_0 = arith.constant 0 : i32
    %c0_i32_1 = arith.constant 0 : i32
    return %c0_i32, %c0_i32_0 : i32, i32
  }
  func.func @transform_4(%arg0: i32) -> (i32, i32) {
    %c0_i32 = arith.constant 0 : i32
    %c0_i32_0 = arith.constant 0 : i32
    %c0_i32_1 = arith.constant 0 : i32
    return %c0_i32, %c0_i32_0 : i32, i32
  }
  func.func @transform_5(%arg0: i32) -> (i32, i32) {
    %c0_i32 = arith.constant 0 : i32
    %c0_i32_0 = arith.constant 0 : i32
    return %arg0, %c0_i32 : i32, i32
  }
}

</mosaic_0001>

<bundles_post_ra>
// kernel: _mlp_forward_impl.1
= control target key start
LH: loop header
LB: loop body
LE: loop exit
PB: predicated region body
PF: predicated region fallthrough
CT: control target
= control target key end

     0   :  { %vm1228_vm0 = vcmask 130048   ;;  %s4515_s1 = inlined_call_operand.vmem [shape: bf16[784,512], index: 1, kind: input, shape index: {}]   ;;  %s4516_s0 = inlined_call_operand.vmem [shape: f32[16,784], index: 0, kind: input, shape index: {}]   ;;  %s4517_s2 = inlined_call_operand.vmem [shape: f32[1,512], index: 2, kind: input, shape index: {}]   ;;  %s4518_s3 = inlined_call_operand.vmem [shape: bf16[512,128], index: 3, kind: input, shape index: {}]   ;;  %s4519_s4 = inlined_call_operand.vmem [shape: f32[1,128], index: 4, kind: input, shape index: {}]   ;;  %s4520_s5 = inlined_call_operand.vmem [shape: bf16[16,128], index: 5, kind: output, shape index: {}]  }
   0x1   :  { %v2074_v0 = vld [vmem:[%s4515_s1 + $0xe0] sm:$0xf]  ;;  %v2906_v1 = vld [vmem:[%s4515_s1 + $0xec] sm:$0xf0] }
   0x2   :  { %v2202_v2 = vld [vmem:[%s4515_s1 + $0x1e0] sm:$0xf]  ;;  %v2075_v3 = vor.u32 %v2906_v1, %v2074_v0  ;;  %v2938_v4 = vld [vmem:[%s4515_s1 + $0x1ec] sm:$0xf0] }
   0x3   :  { %v2330_v5 = vld [vmem:[%s4515_s1 + $0x2e0] sm:$0xf]  ;;  %v2970_v6 = vld [vmem:[%s4515_s1 + $0x2ec] sm:$0xf0]  ;;  %v2203_v7 = vor.u32 %v2938_v4, %v2202_v2 }
   0x4   :  { %v2331_v8 = vor.u32 %v2970_v6, %v2330_v5  ;;  %v2458_v9 = vld [vmem:[%s4515_s1 + $0x3e0] sm:$0xf]  ;;  %v3002_v10 = vld [vmem:[%s4515_s1 + $0x3ec] sm:$0xf0]  ;;  %1232 = vmatpush.bf16.msra.mxu0 %v2075_v3 }
   0x5   :  { %v2058_v11 = vld [vmem:[%s4515_s1 + $0xc0] sm:$0xf]  ;;  %v2459_v12 = vor.u32 %v3002_v10, %v2458_v9  ;;  %v2902_v13 = vld [vmem:[%s4515_s1 + $0xcc] sm:$0xf0]  ;;  %1246 = vmatpush.bf16.msra.mxu1 %v2203_v7 }
   0x6   :  { %v2186_v14 = vld [vmem:[%s4515_s1 + $0x1c0] sm:$0xf]  ;;  %v2934_v15 = vld [vmem:[%s4515_s1 + $0x1cc] sm:$0xf0]  ;;  %1260 = vmatpush.bf16.msra.mxu2 %v2331_v8  ;;  %v2059_v16 = vor.u32 %v2902_v13, %v2058_v11 }
   0x7   :  { %v2187_v17 = vor.u32 %v2934_v15, %v2186_v14  ;;  %v2314_v18 = vld [vmem:[%s4515_s1 + $0x2c0] sm:$0xf]  ;;  %v2966_v19 = vld [vmem:[%s4515_s1 + $0x2cc] sm:$0xf0]  ;;  %1274 = vmatpush.bf16.msra.mxu3 %v2459_v12 }
   0x8   :  { %v2442_v20 = vld [vmem:[%s4515_s1 + $0x3c0] sm:$0xf]  ;;  %v2315_v21 = vor.u32 %v2966_v19, %v2314_v18  ;;  %v2998_v22 = vld [vmem:[%s4515_s1 + $0x3cc] sm:$0xf0]  ;;  %1233 = vmatpush.bf16.msra.mxu0 %v2059_v16 }
   0x9   :  { %v2042_v23 = vld [vmem:[%s4515_s1 + $0xa0] sm:$0xf]  ;;  %v2898_v24 = vld [vmem:[%s4515_s1 + $0xac] sm:$0xf0]  ;;  %v2443_v25 = vor.u32 %v2998_v22, %v2442_v20  ;;  %1247 = vmatpush.bf16.msra.mxu1 %v2187_v17 }
   0xa   :  { %v2170_v26 = vld [vmem:[%s4515_s1 + $0x1a0] sm:$0xf]  ;;  %v2930_v27 = vld [vmem:[%s4515_s1 + $0x1ac] sm:$0xf0]  ;;  %v2043_v29 = vor.u32 %v2898_v24, %v2042_v23  ;;  %1261 = vmatpush.bf16.msra.mxu2 %v2315_v21 }
   0xb   :  { %v2298_v28 = vld [vmem:[%s4515_s1 + $0x2a0] sm:$0xf]  ;;  %v2962_v30 = vld [vmem:[%s4515_s1 + $0x2ac] sm:$0xf0]  ;;  %v2171_v33 = vor.u32 %v2930_v27, %v2170_v26  ;;  %1275 = vmatpush.bf16.msra.mxu3 %v2443_v25 }
   0xc   :  { %v2426_v31 = vld [vmem:[%s4515_s1 + $0x3a0] sm:$0xf]  ;;  %v2994_v32 = vld [vmem:[%s4515_s1 + $0x3ac] sm:$0xf0]  ;;  %v2299_v34 = vor.u32 %v2962_v30, %v2298_v28  ;;  %1234 = vmatpush.bf16.msra.mxu0 %v2043_v29 }
   0xd   :  { %v2026_v35 = vld [vmem:[%s4515_s1 + $0x80] sm:$0xf]  ;;  %v2894_v36 = vld [vmem:[%s4515_s1 + $0x8c] sm:$0xf0]  ;;  %v2427_v38 = vor.u32 %v2994_v32, %v2426_v31  ;;  %1248 = vmatpush.bf16.msra.mxu1 %v2171_v33  ;;  %v2904_v32 = vld [vmem:[%s4515_s1 + $0xe4] sm:$0xf] }
   0xe   :  { %v2154_v37 = vld [vmem:[%s4515_s1 + $0x180] sm:$0xf]  ;;  %v2926_v39 = vld [vmem:[%s4515_s1 + $0x18c] sm:$0xf0]  ;;  %v2027_v44 = vor.u32 %v2894_v36, %v2026_v35  ;;  %1262 = vmatpush.bf16.msra.mxu2 %v2299_v34  ;;  %v2076_v33 = vld [vmem:[%s4515_s1 + $0xf0] sm:$0xf0] }
   0xf   :  { %v2282_v40 = vld [vmem:[%s4515_s1 + $0x280] sm:$0xf]  ;;  %v2958_v41 = vld [vmem:[%s4515_s1 + $0x28c] sm:$0xf0]  ;;  %v2155_v45 = vor.u32 %v2926_v39, %v2154_v37  ;;  %1276 = vmatpush.bf16.msra.mxu3 %v2427_v38  ;;  %v30_v36 = vld [vmem:[%s4516_s0 + $0x48] sm:$0xff] }
  0x10   :  { %v2410_v42 = vld [vmem:[%s4515_s1 + $0x380] sm:$0xf]  ;;  %v2990_v43 = vld [vmem:[%s4515_s1 + $0x38c] sm:$0xf0]  ;;  %v2283_v46 = vor.u32 %v2958_v41, %v2282_v40  ;;  %1235 = vmatpush.bf16.msra.mxu0 %v2027_v44  ;;  %v2936_v41 = vld [vmem:[%s4515_s1 + $0x1e4] sm:$0xf] }
  0x11   :  { %v2010_v47 = vld [vmem:[%s4515_s1 + $0x60] sm:$0xf]  ;;  %v2890_v48 = vld [vmem:[%s4515_s1 + $0x6c] sm:$0xf0]  ;;  %v2411_v50 = vor.u32 %v2990_v43, %v2410_v42  ;;  %1249 = vmatpush.bf16.msra.mxu1 %v2155_v45  ;;  %v28_v43 = vld [vmem:[%s4516_s0 + $0x38] sm:$0xff] }
  0x12   :  { %v2138_v49 = vld [vmem:[%s4515_s1 + $0x160] sm:$0xf]  ;;  %v2922_v51 = vld [vmem:[%s4515_s1 + $0x16c] sm:$0xf0]  ;;  %v2011_v56 = vor.u32 %v2890_v48, %v2010_v47  ;;  %1263 = vmatpush.bf16.msra.mxu2 %v2283_v46  ;;  %v2204_v46 = vld [vmem:[%s4515_s1 + $0x1f0] sm:$0xf0] }
  0x13   :  { %v2266_v52 = vld [vmem:[%s4515_s1 + $0x260] sm:$0xf]  ;;  %v2954_v53 = vld [vmem:[%s4515_s1 + $0x26c] sm:$0xf0]  ;;  %v2139_v57 = vor.u32 %v2922_v51, %v2138_v49  ;;  %1277 = vmatpush.bf16.msra.mxu3 %v2411_v50  ;;  %v24_v47 = vld [vmem:[%s4516_s0 + $0x18] sm:$0xff]  ;;  %v2079_v50 = vor.u32 %v2904_v32, %v2076_v33 }
  0x14   :  { %v2394_v54 = vld [vmem:[%s4515_s1 + $0x360] sm:$0xf]  ;;  %v2986_v55 = vld [vmem:[%s4515_s1 + $0x36c] sm:$0xf0]  ;;  %v2267_v58 = vor.u32 %v2954_v53, %v2266_v52  ;;  %1236 = vmatpush.bf16.msra.mxu0 %v2011_v56 }
  0x15   :  { %v1994_v59 = vld [vmem:[%s4515_s1 + $0x40] sm:$0xf]  ;;  %v2886_v60 = vld [vmem:[%s4515_s1 + $0x4c] sm:$0xf0]  ;;  %v2395_v62 = vor.u32 %v2986_v55, %v2394_v54  ;;  %1250 = vmatpush.bf16.msra.mxu1 %v2139_v57  ;;  %v2900_v57 = vld [vmem:[%s4515_s1 + $0xc4] sm:$0xf] }
  0x16   :  { %v2122_v61 = vld [vmem:[%s4515_s1 + $0x140] sm:$0xf]  ;;  %v2918_v63 = vld [vmem:[%s4515_s1 + $0x14c] sm:$0xf0]  ;;  %v1995_v4 = vor.u32 %v2886_v60, %v1994_v59  ;;  %1264 = vmatpush.bf16.msra.mxu2 %v2267_v58  ;;  %v2060_v58 = vld [vmem:[%s4515_s1 + $0xd0] sm:$0xf0] }
  0x17   :  { %v2250_v0 = vld [vmem:[%s4515_s1 + $0x240] sm:$0xf]  ;;  %v2950_v1 = vld [vmem:[%s4515_s1 + $0x24c] sm:$0xf0]  ;;  %v2123_v6 = vor.u32 %v2918_v63, %v2122_v61  ;;  %1278 = vmatpush.bf16.msra.mxu3 %v2395_v62  ;;  %v22_v61 = vld [vmem:[%s4516_s0 + $0x8] sm:$0xff]  ;;  %v2207_v63 = vor.u32 %v2936_v41, %v2204_v46 }
  0x18   :  { %v2378_v2 = vld [vmem:[%s4515_s1 + $0x340] sm:$0xf]  ;;  %v2982_v3 = vld [vmem:[%s4515_s1 + $0x34c] sm:$0xf0]  ;;  %v2251_v7 = vor.u32 %v2950_v1, %v2250_v0  ;;  %1237 = vmatpush.bf16.msra.mxu0 %v1995_v4  ;;  %v2932_v1 = vld [vmem:[%s4515_s1 + $0x1c4] sm:$0xf]  ;;  %v2063_v4 = vor.u32 %v2900_v57, %v2060_v58 }
  0x19   :  { %v1978_v5 = vld [vmem:[%s4515_s1 + $0x20] sm:$0xf]  ;;  %v2882_v8 = vld [vmem:[%s4515_s1 + $0x2c] sm:$0xf0]  ;;  %v2379_v11 = vor.u32 %v2982_v3, %v2378_v2  ;;  %1251 = vmatpush.bf16.msra.mxu1 %v2123_v6  ;;  %v2188_v2 = vld [vmem:[%s4515_s1 + $0x1d0] sm:$0xf0] }
  0x1a   :  { %v2106_v9 = vld [vmem:[%s4515_s1 + $0x120] sm:$0xf]  ;;  %v2914_v10 = vld [vmem:[%s4515_s1 + $0x12c] sm:$0xf0]  ;;  %v1979_v18 = vor.u32 %v2882_v8, %v1978_v5  ;;  %1265 = vmatpush.bf16.msra.mxu2 %v2251_v7  ;;  %v2140_v41 = vld [vmem:[%s4515_s1 + $0x170] sm:$0xf0] }
  0x1b   :  { %v2234_v12 = vld [vmem:[%s4515_s1 + $0x220] sm:$0xf]  ;;  %v2946_v13 = vld [vmem:[%s4515_s1 + $0x22c] sm:$0xf0]  ;;  %v2107_v23 = vor.u32 %v2914_v10, %v2106_v9  ;;  %1279 = vmatpush.bf16.msra.mxu3 %v2379_v11  ;;  %v2896_v10 = vld [vmem:[%s4515_s1 + $0xa4] sm:$0xf] }
  0x1c   :  { %v2362_v14 = vld [vmem:[%s4515_s1 + $0x320] sm:$0xf]  ;;  %v2978_v15 = vld [vmem:[%s4515_s1 + $0x32c] sm:$0xf0]  ;;  %v2235_v24 = vor.u32 %v2946_v13, %v2234_v12  ;;  %1238 = vmatpush.bf16.msra.mxu0 %v1979_v18  ;;  %v2044_v11 = vld [vmem:[%s4515_s1 + $0xb0] sm:$0xf0]  ;;  %v2191_v12 = vor.u32 %v2932_v1, %v2188_v2 }
  0x1d   :  { %v1962_v16 = vld [vmem:[%s4515_s1] sm:$0xf]  ;;  %v2878_v17 = vld [vmem:[%s4515_s1 + $0xc] sm:$0xf0]  ;;  %v2363_v28 = vor.u32 %v2978_v15, %v2362_v14  ;;  %1252 = vmatpush.bf16.msra.mxu1 %v2107_v23  ;;  %v2928_v14 = vld [vmem:[%s4515_s1 + $0x1a4] sm:$0xf] }
  0x1e   :  { %v2090_v19 = vld [vmem:[%s4515_s1 + $0x100] sm:$0xf]  ;;  %v2910_v20 = vld [vmem:[%s4515_s1 + $0x10c] sm:$0xf0]  ;;  %v1963_v35 = vor.u32 %v2878_v17, %v1962_v16  ;;  %1266 = vmatpush.bf16.msra.mxu2 %v2235_v24  ;;  %v2172_v15 = vld [vmem:[%s4515_s1 + $0x1b0] sm:$0xf0]  ;;  %v2047_v17 = vor.u32 %v2896_v10, %v2044_v11 }
  0x1f   :  { %v2218_v21 = vld [vmem:[%s4515_s1 + $0x200] sm:$0xf]  ;;  %v2942_v22 = vld [vmem:[%s4515_s1 + $0x20c] sm:$0xf0]  ;;  %v2091_v39 = vor.u32 %v2910_v20, %v2090_v19  ;;  %1280 = vmatpush.bf16.msra.mxu3 %v2363_v28  ;;  %v2028_v23 = vld [vmem:[%s4515_s1 + $0x90] sm:$0xf0]  ;;  %v2175_v24 = vor.u32 %v2928_v14, %v2172_v15 }
  0x20   :  { %v2346_v25 = vld [vmem:[%s4515_s1 + $0x300] sm:$0xf]  ;;  %v2974_v26 = vld [vmem:[%s4515_s1 + $0x30c] sm:$0xf0]  ;;  %v2219_v40 = vor.u32 %v2942_v22, %v2218_v21  ;;  %1239 = vmatpush.bf16.msra.mxu0 %v1963_v35  ;;  %v2892_v22 = vld [vmem:[%s4515_s1 + $0x84] sm:$0xf] }
  0x21   :  { %v2586_v27 = vld [vmem:[%s4515_s1 + $0x4e0] sm:$0xf]  ;;  %v3034_v29 = vld [vmem:[%s4515_s1 + $0x4ec] sm:$0xf0]  ;;  %v2347_v44 = vor.u32 %v2974_v26, %v2346_v25  ;;  %1253 = vmatpush.bf16.msra.mxu1 %v2091_v39  ;;  %v2924_v26 = vld [vmem:[%s4515_s1 + $0x184] sm:$0xf] }
  0x22   :  { %v2714_v30 = vld [vmem:[%s4515_s1 + $0x5e0] sm:$0xf]  ;;  %v3066_v31 = vld [vmem:[%s4515_s1 + $0x5ec] sm:$0xf0]  ;;  %v2587_v45 = vor.u32 %v3034_v29, %v2586_v27  ;;  %1267 = vmatpush.bf16.msra.mxu2 %v2219_v40  ;;  %v2156_v27 = vld [vmem:[%s4515_s1 + $0x190] sm:$0xf0]  ;;  %v2031_v29 = vor.u32 %v2892_v22, %v2028_v23 }
  0x23   :  { %v23_v34 = vld [vmem:[%s4516_s0 + $0x10] sm:$0xff]  ;;  %v2730_v37 = vld [vmem:[%s4515_s1 + $0x600] sm:$0xf]  ;;  %v2715_v49 = vor.u32 %v3066_v31, %v2714_v30  ;;  %1281 = vmatpush.bf16.msra.mxu3 %v2347_v44  ;;  %v2920_v40 = vld [vmem:[%s4515_s1 + $0x164] sm:$0xf] }
  0x24   :  { %v3070_v38 = vld [vmem:[%s4515_s1 + $0x60c] sm:$0xf0]  ;;  %v21_v42 = vld [vmem:[%s4516_s0] sm:$0xff]  ;;  %v3389_v54 = vpack.c.bf16 %v30_v36, %v23_v34  ;;  %1288 = vmatpush.bf16.msrb.mxu0 %v2587_v45  ;;  %v2012_v35 = vld [vmem:[%s4515_s1 + $0x70] sm:$0xf0] }
  0x25   :  { %v31_v48 = vld [vmem:[%s4516_s0 + $0x50] sm:$0xff]  ;;  %v2570_v51 = vld [vmem:[%s4515_s1 + $0x4c0] sm:$0xf]  ;;  %v3391_v55 = vpack.c.bf16 %v28_v43, %v21_v42  ;;  %v2731_v59 = vor.u32 %v3070_v38, %v2730_v37  ;;  %1302 = vmatpush.bf16.msrb.mxu1 %v2715_v49  ;;  %v2888_v34 = vld [vmem:[%s4515_s1 + $0x64] sm:$0xf]  ;;  %v2159_v38 = vor.u32 %v2924_v26, %v2156_v27 }
  0x26   :  { %v3030_v52 = vld [vmem:[%s4515_s1 + $0x4cc] sm:$0xf0]  ;;  %v2698_v53 = vld [vmem:[%s4515_s1 + $0x5c0] sm:$0xf]  ;;  %v3402_v60 = vpack.c.bf16 %v31_v48, %v24_v47  ;;  %1268 = vmatmul.bf16.vlgmr.msra.gmra.mxu2 %v3389_v54  ;;  %v34_v37 = vld [vmem:[%s4516_s0 + $0x68] sm:$0xff]  ;;  %v2015_v43 = vor.u32 %v2888_v34, %v2012_v35 }
  0x27   :  { %v3062_v56 = vld [vmem:[%s4515_s1 + $0x5cc] sm:$0xf0]  ;;  %v29_v62 = vld [vmem:[%s4516_s0 + $0x40] sm:$0xff]  ;;  %v2571_v0 = vor.u32 %v3030_v52, %v2570_v51  ;;  %1330 = vmatpush.bf16.msrb.mxu3 %v2079_v50  ;;  %1240 = vmatmul.bf16.vlgmr.msra.gmra.mxu0 %v3391_v55  ;;  %v1996_v49 = vld [vmem:[%s4515_s1 + $0x50] sm:$0xf0]  ;;  %v2143_v51 = vor.u32 %v2920_v40, %v2140_v41 }
  0x28   :  { %v2699_v3 = vor.u32 %v3062_v56, %v2698_v53  ;;  %v2554_v5 = vld [vmem:[%s4515_s1 + $0x4a0] sm:$0xf]  ;;  %v3026_v6 = vld [vmem:[%s4515_s1 + $0x4ac] sm:$0xf0]  ;;  %v3427_v8 = vpack.c.bf16 %v29_v62, %v22_v61  ;;  %1323 = vmatpush.bf16.msrb.mxu2 %v2731_v59  ;;  %1282 = vmatmul.bf16.vlgmr.msra.gmra.mxu3 %v3402_v60  ;;  %v2884_v48 = vld [vmem:[%s4515_s1 + $0x44] sm:$0xf] }
  0x29   :  { %v2682_v7 = vld [vmem:[%s4515_s1 + $0x5a0] sm:$0xf]  ;;  %v3058_v9 = vld [vmem:[%s4515_s1 + $0x5ac] sm:$0xf0]  ;;  %1289 = vmatpush.bf16.msrb.mxu0 %v2571_v0  ;;  %v2555_v13 = vor.u32 %v3026_v6, %v2554_v5  ;;  %v2916_v53 = vld [vmem:[%s4515_s1 + $0x144] sm:$0xf]  ;;  %v1999_v58 = vor.u32 %v2884_v48, %v1996_v49 }
  0x2a   :  { %1303 = vmatpush.bf16.msrb.mxu1 %v2699_v3  ;;  %v2683_v16 = vor.u32 %v3058_v9, %v2682_v7  ;;  %v2538_v18 = vld [vmem:[%s4515_s1 + $0x480] sm:$0xf]  ;;  %v3022_v19 = vld [vmem:[%s4515_s1 + $0x48c] sm:$0xf0]  ;;  %v2124_v56 = vld [vmem:[%s4515_s1 + $0x150] sm:$0xf0] }
  0x2b   :  { %1331 = vmatpush.bf16.msrb.mxu3 %v2063_v4  ;;  %v2666_v20 = vld [vmem:[%s4515_s1 + $0x580] sm:$0xf]  ;;  %1254 = vmatmul.bf16.vlgmr.msra.gmra.mxu1 %v3427_v8  ;;  %v3054_v21 = vld [vmem:[%s4515_s1 + $0x58c] sm:$0xf0]  ;;  %v2539_v25 = vor.u32 %v3022_v19, %v2538_v18  ;;  %v2880_v0 = vld [vmem:[%s4515_s1 + $0x24] sm:$0xf]  ;;  %v2127_v4 = vor.u32 %v2916_v53, %v2124_v56 }
  0x2c   :  { %1344 = vmatpush.bf16.msra.mxu2 %v2207_v63  ;;  %v2667_v28 = vor.u32 %v3054_v21, %v2666_v20  ;;  %v2522_v30 = vld [vmem:[%s4515_s1 + $0x460] sm:$0xf]  ;;  %v3018_v31 = vld [vmem:[%s4515_s1 + $0x46c] sm:$0xf0]  ;;  %v1980_v1 = vld [vmem:[%s4515_s1 + $0x30] sm:$0xf0] }
  0x2d   :  { %1290 = vmatpush.bf16.msrb.mxu0 %v2555_v13  ;;  %v2650_v32 = vld [vmem:[%s4515_s1 + $0x560] sm:$0xf]  ;;  %v3050_v33 = vld [vmem:[%s4515_s1 + $0x56c] sm:$0xf0]  ;;  %v2523_v39 = vor.u32 %v3018_v31, %v2522_v30  ;;  %v2912_v2 = vld [vmem:[%s4515_s1 + $0x124] sm:$0xf]  ;;  %v1983_v11 = vor.u32 %v2880_v0, %v1980_v1 }
  0x2e   :  { %1304 = vmatpush.bf16.msrb.mxu1 %v2683_v16  ;;  %v27_v36 = vld [vmem:[%s4516_s0 + $0x30] sm:$0xff]  ;;  %v2651_v42 = vor.u32 %v3050_v33, %v2650_v32  ;;  %v2506_v44 = vld [vmem:[%s4515_s1 + $0x440] sm:$0xf]  ;;  %v2876_v13 = vld [vmem:[%s4515_s1 + $0x4] sm:$0xf] }
  0x2f   :  { %1332 = vmatpush.bf16.msrb.mxu3 %v2047_v17  ;;  %v3014_v45 = vld [vmem:[%s4515_s1 + $0x44c] sm:$0xf0]  ;;  %v2634_v46 = vld [vmem:[%s4515_s1 + $0x540] sm:$0xf]  ;;  %v3518_v50 = vpack.c.bf16 %v34_v37, %v27_v36  ;;  %v2108_v3 = vld [vmem:[%s4515_s1 + $0x130] sm:$0xf0] }
  0x30   :  { %1345 = vmatpush.bf16.msra.mxu2 %v2191_v12  ;;  %v3046_v47 = vld [vmem:[%s4515_s1 + $0x54c] sm:$0xf0]  ;;  %v2507_v52 = vor.u32 %v3014_v45, %v2506_v44  ;;  %v2490_v59 = vld [vmem:[%s4515_s1 + $0x420] sm:$0xf]  ;;  %v1964_v14 = vld [vmem:[%s4515_s1 + $0x10] sm:$0xf0]  ;;  %v2111_v21 = vor.u32 %v2912_v2, %v2108_v3 }
  0x31   :  { %1291 = vmatpush.bf16.msrb.mxu0 %v2539_v25  ;;  %v2635_v57 = vor.u32 %v3046_v47, %v2634_v46  ;;  %v3010_v61 = vld [vmem:[%s4515_s1 + $0x42c] sm:$0xf0]  ;;  %v2618_v62 = vld [vmem:[%s4515_s1 + $0x520] sm:$0xf]  ;;  %v2968_v15 = vld [vmem:[%s4515_s1 + $0x2e4] sm:$0xf]  ;;  %v1967_v27 = vor.u32 %v2876_v13, %v1964_v14 }
  0x32   :  { %1305 = vmatpush.bf16.msrb.mxu1 %v2667_v28  ;;  %v3042_v63 = vld [vmem:[%s4515_s1 + $0x52c] sm:$0xf0]  ;;  %v2491_v5 = vor.u32 %v3010_v61, %v2490_v59  ;;  %v2474_v6 = vld [vmem:[%s4515_s1 + $0x400] sm:$0xf]  ;;  %v2332_v16 = vld [vmem:[%s4515_s1 + $0x2f0] sm:$0xf0] }
  0x33   :  { %1333 = vmatpush.bf16.msrb.mxu3 %v2031_v29  ;;  %v3006_v7 = vld [vmem:[%s4515_s1 + $0x40c] sm:$0xf0]  ;;  %v2602_v9 = vld [vmem:[%s4515_s1 + $0x500] sm:$0xf]  ;;  %v2619_v10 = vor.u32 %v3042_v63, %v2618_v62  ;;  %v3000_v17 = vld [vmem:[%s4515_s1 + $0x3e4] sm:$0xf]  ;;  %v2335_v31 = vor.u32 %v2968_v15, %v2332_v16 }
  0x34   :  { %1346 = vmatpush.bf16.msra.mxu2 %v2175_v24  ;;  %v3038_v12 = vld [vmem:[%s4515_s1 + $0x50c] sm:$0xf0]  ;;  %v2460_v18 = vld [vmem:[%s4515_s1 + $0x3f0] sm:$0xf0]  ;;  %v3032_v19 = vld [vmem:[%s4515_s1 + $0x4e4] sm:$0xf]  ;;  %v2475_v22 = vor.u32 %v3006_v7, %v2474_v6 }
  0x35   :  { %1292 = vmatpush.bf16.msrb.mxu0 %v2523_v39  ;;  %v2588_v20 = vld [vmem:[%s4515_s1 + $0x4f0] sm:$0xf0]  ;;  %v25_v23 = vld [vmem:[%s4516_s0 + $0x20] sm:$0xff]  ;;  %v32_v24 = vld [vmem:[%s4516_s0 + $0x58] sm:$0xff]  ;;  %v2603_v26 = vor.u32 %v3038_v12, %v2602_v9  ;;  %v2463_v32 = vor.u32 %v3000_v17, %v2460_v18 }
  0x36   :  { %1306 = vmatpush.bf16.msrb.mxu1 %v2651_v42  ;;  %2744 = vmatmul.msk.bf16.vlgmr.msrb.gmra.mxu2 %vm1228_vm0, %v3518_v50  ;;  %v2908_v25 = vld [vmem:[%s4515_s1 + $0x104] sm:$0xf]  ;;  %v2092_v28 = vld [vmem:[%s4515_s1 + $0x110] sm:$0xf0]  ;;  %v26_v29 = vld [vmem:[%s4516_s0 + $0x28] sm:$0xff]  ;;  %v2591_v36 = vor.u32 %v3032_v19, %v2588_v20  ;;  %v3615_v37 = vpack.c.bf16 %v32_v24, %v25_v23 }
  0x37   :  { %1334 = vmatpush.bf16.msrb.mxu3 %v2015_v43  ;;  %v33_v30 = vld [vmem:[%s4516_s0 + $0x60] sm:$0xff]  ;;  %v2716_v34 = vld [vmem:[%s4515_s1 + $0x5f0] sm:$0xf0]  ;;  %v2095_v41 = vor.u32 %v2908_v25, %v2092_v28 }
  0x38   :  { %1347 = vmatpush.bf16.msra.mxu2 %v2159_v38  ;;  %v3064_v33 = vld [vmem:[%s4515_s1 + $0x5e4] sm:$0xf]  ;;  %v2316_v38 = vld [vmem:[%s4515_s1 + $0x2d0] sm:$0xf0]  ;;  %v3626_v42 = vpack.c.bf16 %v33_v30, %v26_v29 }
  0x39   :  { %1293 = vmatpush.bf16.msrb.mxu0 %v2507_v52  ;;  %v2964_v35 = vld [vmem:[%s4515_s1 + $0x2c4] sm:$0xf]  ;;  %v2444_v40 = vld [vmem:[%s4515_s1 + $0x3d0] sm:$0xf0]  ;;  %v2719_v45 = vor.u32 %v3064_v33, %v2716_v34 }
  0x3a   :  { %1307 = vmatpush.bf16.msrb.mxu1 %v2635_v57  ;;  %v2996_v39 = vld [vmem:[%s4515_s1 + $0x3c4] sm:$0xf]  ;;  %v2572_v44 = vld [vmem:[%s4515_s1 + $0x4d0] sm:$0xf0]  ;;  %v2319_v46 = vor.u32 %v2964_v35, %v2316_v38 }
  0x3b   :  { %1335 = vmatpush.bf16.msrb.mxu3 %v1999_v58  ;;  %v3028_v43 = vld [vmem:[%s4515_s1 + $0x4c4] sm:$0xf]  ;;  %v2447_v47 = vor.u32 %v2996_v39, %v2444_v40  ;;  %v2700_v49 = vld [vmem:[%s4515_s1 + $0x5d0] sm:$0xf0] }
  0x3c   :  { %1348 = vmatpush.bf16.msra.mxu2 %v2143_v51  ;;  %v3060_v48 = vld [vmem:[%s4515_s1 + $0x5c4] sm:$0xf]  ;;  %v2575_v52 = vor.u32 %v3028_v43, %v2572_v44  ;;  %v2300_v53 = vld [vmem:[%s4515_s1 + $0x2b0] sm:$0xf0] }
  0x3d   :  { %1294 = vmatpush.bf16.msrb.mxu0 %v2491_v5  ;;  %v2960_v51 = vld [vmem:[%s4515_s1 + $0x2a4] sm:$0xf]  ;;  %v2428_v57 = vld [vmem:[%s4515_s1 + $0x3b0] sm:$0xf0]  ;;  %v2703_v61 = vor.u32 %v3060_v48, %v2700_v49 }
  0x3e   :  { %1308 = vmatpush.bf16.msrb.mxu1 %v2619_v10  ;;  %v2992_v56 = vld [vmem:[%s4515_s1 + $0x3a4] sm:$0xf]  ;;  %v2556_v59 = vld [vmem:[%s4515_s1 + $0x4b0] sm:$0xf0]  ;;  %v2303_v62 = vor.u32 %v2960_v51, %v2300_v53 }
  0x3f   :  { %1336 = vmatpush.bf16.msrb.mxu3 %v1983_v11  ;;  %v3024_v58 = vld [vmem:[%s4515_s1 + $0x4a4] sm:$0xf]  ;;  %v2431_v63 = vor.u32 %v2992_v56, %v2428_v57  ;;  %v2684_v1 = vld [vmem:[%s4515_s1 + $0x5b0] sm:$0xf0] }
  0x40   :  { %1349 = vmatpush.bf16.msra.mxu2 %v2127_v4  ;;  %v3056_v0 = vld [vmem:[%s4515_s1 + $0x5a4] sm:$0xf]  ;;  %v2559_v3 = vor.u32 %v3024_v58, %v2556_v59  ;;  %v2284_v4 = vld [vmem:[%s4515_s1 + $0x290] sm:$0xf0] }
  0x41   :  { %1295 = vmatpush.bf16.msrb.mxu0 %v2475_v22  ;;  %v2956_v2 = vld [vmem:[%s4515_s1 + $0x284] sm:$0xf]  ;;  %v2412_v6 = vld [vmem:[%s4515_s1 + $0x390] sm:$0xf0]  ;;  %v2687_v10 = vor.u32 %v3056_v0, %v2684_v1  ;;  %v2082_v0 = vld [vmem:[%s4515_s1 + $0xe8] sm:$0xf] }
  0x42   :  { %1309 = vmatpush.bf16.msrb.mxu1 %v2603_v26  ;;  %v2988_v5 = vld [vmem:[%s4515_s1 + $0x384] sm:$0xf]  ;;  %v2540_v9 = vld [vmem:[%s4515_s1 + $0x490] sm:$0xf0]  ;;  %v2287_v11 = vor.u32 %v2956_v2, %v2284_v4  ;;  %v2907_v1 = vld [vmem:[%s4515_s1 + $0xf4] sm:$0xf0] }
  0x43   :  { %1337 = vmatpush.bf16.msrb.mxu3 %v1967_v27  ;;  %v3020_v7 = vld [vmem:[%s4515_s1 + $0x484] sm:$0xf]  ;;  %v2415_v12 = vor.u32 %v2988_v5, %v2412_v6  ;;  %v2668_v14 = vld [vmem:[%s4515_s1 + $0x590] sm:$0xf0]  ;;  %v2338_v5 = vld [vmem:[%s4515_s1 + $0x2e8] sm:$0xf] }
  0x44   :  { %1350 = vmatpush.bf16.msra.mxu2 %v2111_v21  ;;  %1296 = vmatmul.bf16.vlgmr.msrb.gmra.mxu0 %v3615_v37  ;;  %v3052_v13 = vld [vmem:[%s4515_s1 + $0x584] sm:$0xf]  ;;  %v2543_v16 = vor.u32 %v3020_v7, %v2540_v9  ;;  %v2268_v17 = vld [vmem:[%s4515_s1 + $0x270] sm:$0xf0]  ;;  %v2971_v6 = vld [vmem:[%s4515_s1 + $0x2f4] sm:$0xf0] }
  0x45   :  { %1358 = vmatpush.bf16.msra.mxu0 %v2335_v31  ;;  %1310 = vmatmul.bf16.vlgmr.msrb.gmra.mxu1 %v3626_v42  ;;  %v2952_v15 = vld [vmem:[%s4515_s1 + $0x264] sm:$0xf]  ;;  %v2396_v19 = vld [vmem:[%s4515_s1 + $0x370] sm:$0xf0]  ;;  %v2671_v22 = vor.u32 %v3052_v13, %v2668_v14  ;;  %v2083_v13 = vor.u32 %v2907_v1, %v2082_v0  ;;  %v2466_v14 = vld [vmem:[%s4515_s1 + $0x3e8] sm:$0xf] }
  0x46   :  { %1372 = vmatpush.bf16.msra.mxu1 %v2463_v32  ;;  %1338 = vmatmul.bf16.vlgmr.msrb.gmra.mxu3 %v3391_v55  ;;  %v2984_v18 = vld [vmem:[%s4515_s1 + $0x364] sm:$0xf]  ;;  %v2524_v21 = vld [vmem:[%s4515_s1 + $0x470] sm:$0xf0]  ;;  %v2271_v23 = vor.u32 %v2952_v15, %v2268_v17  ;;  %v3003_v15 = vld [vmem:[%s4515_s1 + $0x3f4] sm:$0xf0] }
  0x47   :  { %1386 = vmatpush.bf16.msra.mxu3 %v2591_v36  ;;  %v3016_v20 = vld [vmem:[%s4515_s1 + $0x464] sm:$0xf]  ;;  %v2399_v24 = vor.u32 %v2984_v18, %v2396_v19  ;;  %v2652_v26 = vld [vmem:[%s4515_s1 + $0x570] sm:$0xf0]  ;;  %v2210_v17 = vld [vmem:[%s4515_s1 + $0x1e8] sm:$0xf]  ;;  %v2339_v19 = vor.u32 %v2971_v6, %v2338_v5 }
  0x48   :  { %1351 = vmatpush.bf16.msra.mxu2 %v2095_v41  ;;  %v3048_v25 = vld [vmem:[%s4515_s1 + $0x564] sm:$0xf]  ;;  %v2527_v28 = vor.u32 %v3016_v20, %v2524_v21  ;;  %v2252_v29 = vld [vmem:[%s4515_s1 + $0x250] sm:$0xf0]  ;;  %v2939_v18 = vld [vmem:[%s4515_s1 + $0x1f4] sm:$0xf0] }
  0x49   :  { %1359 = vmatpush.bf16.msra.mxu0 %v2319_v46  ;;  %v2948_v27 = vld [vmem:[%s4515_s1 + $0x244] sm:$0xf]  ;;  %v2380_v31 = vld [vmem:[%s4515_s1 + $0x350] sm:$0xf0]  ;;  %v2655_v34 = vor.u32 %v3048_v25, %v2652_v26  ;;  %v2066_v21 = vld [vmem:[%s4515_s1 + $0xc8] sm:$0xf]  ;;  %v2211_v26 = vor.u32 %v2939_v18, %v2210_v17 }
  0x4a   :  { %1373 = vmatpush.bf16.msra.mxu1 %v2447_v47  ;;  %v2980_v30 = vld [vmem:[%s4515_s1 + $0x344] sm:$0xf]  ;;  %v2508_v33 = vld [vmem:[%s4515_s1 + $0x450] sm:$0xf0]  ;;  %v2255_v35 = vor.u32 %v2948_v27, %v2252_v29  ;;  %v2967_v25 = vld [vmem:[%s4515_s1 + $0x2d4] sm:$0xf0] }
  0x4b   :  { %1387 = vmatpush.bf16.msra.mxu3 %v2575_v52  ;;  %1352 = vmatmul.bf16.vlgmr.msra.gmra.mxu2 %v3427_v8  ;;  %v3012_v32 = vld [vmem:[%s4515_s1 + $0x444] sm:$0xf]  ;;  %v2383_v36 = vor.u32 %v2980_v30, %v2380_v31  ;;  %v2636_v39 = vld [vmem:[%s4515_s1 + $0x550] sm:$0xf0]  ;;  %v2450_v27 = vld [vmem:[%s4515_s1 + $0x3c8] sm:$0xf] }
  0x4c   :  { %1400 = vmatpush.bf16.msrb.mxu2 %v2719_v45  ;;  %v3044_v38 = vld [vmem:[%s4515_s1 + $0x544] sm:$0xf]  ;;  %v2511_v41 = vor.u32 %v3012_v32, %v2508_v33  ;;  %v2236_v43 = vld [vmem:[%s4515_s1 + $0x230] sm:$0xf0]  ;;  %v2194_v30 = vld [vmem:[%s4515_s1 + $0x1c8] sm:$0xf] }
  0x4d   :  { %1360 = vmatpush.bf16.msra.mxu0 %v2303_v62  ;;  %v2944_v40 = vld [vmem:[%s4515_s1 + $0x224] sm:$0xf]  ;;  %v2364_v45 = vld [vmem:[%s4515_s1 + $0x330] sm:$0xf0]  ;;  %v2639_v48 = vor.u32 %v3044_v38, %v2636_v39  ;;  %v2935_v31 = vld [vmem:[%s4515_s1 + $0x1d4] sm:$0xf0] }
  0x4e   :  { %1374 = vmatpush.bf16.msra.mxu1 %v2431_v63  ;;  %v2976_v44 = vld [vmem:[%s4515_s1 + $0x324] sm:$0xf]  ;;  %v2492_v47 = vld [vmem:[%s4515_s1 + $0x430] sm:$0xf0]  ;;  %v2239_v52 = vor.u32 %v2944_v40, %v2236_v43  ;;  %v2050_v33 = vld [vmem:[%s4515_s1 + $0xa8] sm:$0xf]  ;;  %v2195_v39 = vor.u32 %v2935_v31, %v2194_v30 }
  0x4f   :  { %1388 = vmatpush.bf16.msra.mxu3 %v2559_v3  ;;  %v3008_v46 = vld [vmem:[%s4515_s1 + $0x424] sm:$0xf]  ;;  %v2620_v51 = vld [vmem:[%s4515_s1 + $0x530] sm:$0xf0]  ;;  %v2367_v53 = vor.u32 %v2976_v44, %v2364_v45  ;;  %v2963_v38 = vld [vmem:[%s4515_s1 + $0x2b4] sm:$0xf0] }
  0x50   :  { %1401 = vmatpush.bf16.msrb.mxu2 %v2703_v61  ;;  %v3040_v49 = vld [vmem:[%s4515_s1 + $0x524] sm:$0xf]  ;;  %v2220_v57 = vld [vmem:[%s4515_s1 + $0x210] sm:$0xf0]  ;;  %v2495_v59 = vor.u32 %v3008_v46, %v2492_v47  ;;  %v2434_v40 = vld [vmem:[%s4515_s1 + $0x3a8] sm:$0xf] }
  0x51   :  { %1361 = vmatpush.bf16.msra.mxu0 %v2287_v11  ;;  %v2940_v56 = vld [vmem:[%s4515_s1 + $0x204] sm:$0xf]  ;;  %v2348_v61 = vld [vmem:[%s4515_s1 + $0x310] sm:$0xf0]  ;;  %v2623_v3 = vor.u32 %v3040_v49, %v2620_v51  ;;  %v2178_v44 = vld [vmem:[%s4515_s1 + $0x1a8] sm:$0xf] }
  0x52   :  { %1375 = vmatpush.bf16.msra.mxu1 %v2415_v12  ;;  %v2972_v58 = vld [vmem:[%s4515_s1 + $0x304] sm:$0xf]  ;;  %v2476_v63 = vld [vmem:[%s4515_s1 + $0x410] sm:$0xf0]  ;;  %v2223_v7 = vor.u32 %v2940_v56, %v2220_v57  ;;  %v2931_v45 = vld [vmem:[%s4515_s1 + $0x1b4] sm:$0xf0] }
  0x53   :  { %1389 = vmatpush.bf16.msra.mxu3 %v2543_v16  ;;  %v3004_v62 = vld [vmem:[%s4515_s1 + $0x404] sm:$0xf]  ;;  %v2732_v4 = vld [vmem:[%s4515_s1 + $0x610] sm:$0xf0]  ;;  %v2351_v9 = vor.u32 %v2972_v58, %v2348_v61  ;;  %v2034_v47 = vld [vmem:[%s4515_s1 + $0x88] sm:$0xf] }
  0x54   :  { %1402 = vmatpush.bf16.msrb.mxu2 %v2687_v10  ;;  %v3068_v2 = vld [vmem:[%s4515_s1 + $0x604] sm:$0xf]  ;;  %v2604_v11 = vld [vmem:[%s4515_s1 + $0x510] sm:$0xf0]  ;;  %v2479_v12 = vor.u32 %v3004_v62, %v2476_v63  ;;  %v2290_v51 = vld [vmem:[%s4515_s1 + $0x288] sm:$0xf] }
  0x55   :  { %1362 = vmatpush.bf16.msra.mxu0 %v2271_v23  ;;  %v3036_v10 = vld [vmem:[%s4515_s1 + $0x504] sm:$0xf]  ;;  %v2735_v16 = vor.u32 %v3068_v2, %v2732_v4  ;;  %v2467_v23 = vor.u32 %v3003_v15, %v2466_v14  ;;  %v2418_v56 = vld [vmem:[%s4515_s1 + $0x388] sm:$0xf]  ;;  %v2991_v57 = vld [vmem:[%s4515_s1 + $0x394] sm:$0xf0] }
  0x56   :  { %1376 = vmatpush.bf16.msra.mxu1 %v2399_v24  ;;  %v2607_v20 = vor.u32 %v3036_v10, %v2604_v11  ;;  %v2322_v24 = vld [vmem:[%s4515_s1 + $0x2c8] sm:$0xf]  ;;  %v2927_v61 = vld [vmem:[%s4515_s1 + $0x194] sm:$0xf0]  ;;  %v2419_v1 = vor.u32 %v2991_v57, %v2418_v56  ;;  %v2905_v56 = vld [vmem:[%s4515_s1 + $0xec] sm:$0xf] }
  0x57   :  { %1390 = vmatpush.bf16.msra.mxu3 %v2527_v28  ;;  %v2999_v28 = vld [vmem:[%s4515_s1 + $0x3d4] sm:$0xf0]  ;;  %v2323_v32 = vor.u32 %v2967_v25, %v2322_v24  ;;  %v2018_v63 = vld [vmem:[%s4515_s1 + $0x68] sm:$0xf]  ;;  %v2084_v57 = vld [vmem:[%s4515_s1 + $0xf8] sm:$0xf0] }
  0x58   :  { %1403 = vmatpush.bf16.msrb.mxu2 %v2671_v22  ;;  %v2903_v22 = vld [vmem:[%s4515_s1 + $0xd4] sm:$0xf0]  ;;  %v2274_v2 = vld [vmem:[%s4515_s1 + $0x268] sm:$0xf] }
  0x59   :  { %1363 = vmatpush.bf16.msra.mxu0 %v2255_v35  ;;  %v2067_v29 = vor.u32 %v2903_v22, %v2066_v21  ;;  %v2451_v35 = vor.u32 %v2999_v28, %v2450_v27  ;;  %v2891_v0 = vld [vmem:[%s4515_s1 + $0x74] sm:$0xf0]  ;;  %v2402_v5 = vld [vmem:[%s4515_s1 + $0x368] sm:$0xf] }
  0x5a   :  { %1377 = vmatpush.bf16.msra.mxu1 %v2383_v36  ;;  %v2306_v36 = vld [vmem:[%s4515_s1 + $0x2a8] sm:$0xf]  ;;  %v2987_v6 = vld [vmem:[%s4515_s1 + $0x374] sm:$0xf0] }
  0x5b   :  { %1391 = vmatpush.bf16.msra.mxu3 %v2511_v41  ;;  %v2995_v41 = vld [vmem:[%s4515_s1 + $0x3b4] sm:$0xf0]  ;;  %v2307_v46 = vor.u32 %v2963_v38, %v2306_v36  ;;  %v2403_v14 = vor.u32 %v2987_v6, %v2402_v5  ;;  %v2258_v15 = vld [vmem:[%s4515_s1 + $0x248] sm:$0xf]  ;;  %v2087_v6 = vor.u32 %v2905_v56, %v2084_v57 }
  0x5c   :  { %1404 = vmatpush.bf16.msrb.mxu2 %v2655_v34  ;;  %v2899_v34 = vld [vmem:[%s4515_s1 + $0xb4] sm:$0xf0]  ;;  %v2435_v49 = vor.u32 %v2995_v41, %v2434_v40  ;;  %v2386_v18 = vld [vmem:[%s4515_s1 + $0x348] sm:$0xf] }
  0x5d   :  { %1364 = vmatpush.bf16.msra.mxu0 %v2239_v52  ;;  %v2051_v43 = vor.u32 %v2899_v34, %v2050_v33  ;;  %v2959_v52 = vld [vmem:[%s4515_s1 + $0x294] sm:$0xf0]  ;;  %v2130_v21 = vld [vmem:[%s4515_s1 + $0x148] sm:$0xf] }
  0x5e   :  { %1378 = vmatpush.bf16.msra.mxu1 %v2367_v53  ;;  %v2179_v53 = vor.u32 %v2931_v45, %v2178_v44  ;;  %v2291_v62 = vor.u32 %v2959_v52, %v2290_v51  ;;  %v2923_v10 = vld [vmem:[%s4515_s1 + $0x174] sm:$0xf0]  ;;  %v1986_v24 = vld [vmem:[%s4515_s1 + $0x28] sm:$0xf] }
  0x5f   :  { %1392 = vmatpush.bf16.msra.mxu3 %v2495_v59  ;;  %v2162_v59 = vld [vmem:[%s4515_s1 + $0x188] sm:$0xf]  ;;  %v2919_v22 = vld [vmem:[%s4515_s1 + $0x154] sm:$0xf0] }
  0x60   :  { %1405 = vmatpush.bf16.msrb.mxu2 %v2639_v48  ;;  %v2895_v48 = vld [vmem:[%s4515_s1 + $0x94] sm:$0xf0]  ;;  %v2163_v4 = vor.u32 %v2927_v61, %v2162_v59  ;;  %v2242_v27 = vld [vmem:[%s4515_s1 + $0x228] sm:$0xf] }
  0x61   :  { %1365 = vmatpush.bf16.msra.mxu0 %v2223_v7  ;;  %v2035_v58 = vor.u32 %v2895_v48, %v2034_v47  ;;  %v2019_v7 = vor.u32 %v2891_v0, %v2018_v63  ;;  %v2883_v25 = vld [vmem:[%s4515_s1 + $0x34] sm:$0xf0]  ;;  %v2370_v30 = vld [vmem:[%s4515_s1 + $0x328] sm:$0xf] }
  0x62   :  { %1379 = vmatpush.bf16.msra.mxu1 %v2351_v9  ;;  %v2146_v9 = vld [vmem:[%s4515_s1 + $0x168] sm:$0xf]  ;;  %v2947_v28 = vld [vmem:[%s4515_s1 + $0x234] sm:$0xf0] }
  0x63   :  { %1393 = vmatpush.bf16.msra.mxu3 %v2479_v12  ;;  %v2002_v12 = vld [vmem:[%s4515_s1 + $0x48] sm:$0xf]  ;;  %v2147_v17 = vor.u32 %v2923_v10, %v2146_v9  ;;  %v2979_v31 = vld [vmem:[%s4515_s1 + $0x334] sm:$0xf0]  ;;  %v2243_v36 = vor.u32 %v2947_v28, %v2242_v27  ;;  %v2901_v9 = vld [vmem:[%s4515_s1 + $0xcc] sm:$0xf] }
  0x64   :  { %1406 = vmatpush.bf16.msrb.mxu2 %v2623_v3  ;;  %1366 = vmatmul.bf16.vlgmr.msra.gmra.mxu0 %v3389_v54  ;;  %v2955_v3 = vld [vmem:[%s4515_s1 + $0x274] sm:$0xf0]  ;;  %v2114_v33 = vld [vmem:[%s4515_s1 + $0x128] sm:$0xf]  ;;  %v2371_v41 = vor.u32 %v2979_v31, %v2370_v30  ;;  %v2068_v10 = vld [vmem:[%s4515_s1 + $0xd8] sm:$0xf0] }
  0x65   :  { %1456 = vmatpush.bf16.msrb.mxu0 %v2339_v19  ;;  %1380 = vmatmul.bf16.vlgmr.msra.gmra.mxu1 %v3402_v60  ;;  %v2275_v11 = vor.u32 %v2955_v3, %v2274_v2  ;;  %v2983_v19 = vld [vmem:[%s4515_s1 + $0x354] sm:$0xf0]  ;;  %v2226_v44 = vld [vmem:[%s4515_s1 + $0x208] sm:$0xf]  ;;  %v2937_v3 = vld [vmem:[%s4515_s1 + $0x1ec] sm:$0xf] }
  0x66   :  { %1428 = vmatpush.bf16.msrb.mxu1 %v2083_v13  ;;  %1394 = vmatmul.bf16.vlgmr.msra.gmra.mxu3 %v3615_v37  ;;  %v2887_v13 = vld [vmem:[%s4515_s1 + $0x54] sm:$0xf0]  ;;  %v2722_v61 = vld [vmem:[%s4515_s1 + $0x5e8] sm:$0xf]  ;;  %v2180_v30 = vld [vmem:[%s4515_s1 + $0x1b8] sm:$0xf0] }
  0x67   :  { %1421 = vmatpush.bf16.msrb.mxu3 %v2735_v16  ;;  %v2951_v16 = vld [vmem:[%s4515_s1 + $0x254] sm:$0xf0]  ;;  %v2578_v63 = vld [vmem:[%s4515_s1 + $0x4c8] sm:$0xf] }
  0x68   :  { %1407 = vmatpush.bf16.msrb.mxu2 %v2607_v20  ;;  %v2003_v20 = vor.u32 %v2887_v13, %v2002_v12  ;;  %v2915_v34 = vld [vmem:[%s4515_s1 + $0x134] sm:$0xf0]  ;;  %v2706_v13 = vld [vmem:[%s4515_s1 + $0x5c8] sm:$0xf] }
  0x69   :  { %1457 = vmatpush.bf16.msrb.mxu0 %v2323_v32  ;;  %v1987_v32 = vor.u32 %v2883_v25, %v1986_v24  ;;  %v2879_v38 = vld [vmem:[%s4515_s1 + $0x14] sm:$0xf0]  ;;  %v2115_v47 = vor.u32 %v2915_v34, %v2114_v33  ;;  %v2690_v25 = vld [vmem:[%s4515_s1 + $0x5a8] sm:$0xf]  ;;  %v2893_v33 = vld [vmem:[%s4515_s1 + $0x8c] sm:$0xf] }
  0x6a   :  { %1429 = vmatpush.bf16.msrb.mxu1 %v2067_v29  ;;  %v2131_v29 = vor.u32 %v2919_v22, %v2130_v21  ;;  %v3035_v40 = vld [vmem:[%s4515_s1 + $0x4f4] sm:$0xf0]  ;;  %v2897_v21 = vld [vmem:[%s4515_s1 + $0xac] sm:$0xf]  ;;  %v2052_v22 = vld [vmem:[%s4515_s1 + $0xb8] sm:$0xf0] }
  0x6b   :  { %1442 = vmatpush.bf16.msra.mxu3 %v2211_v26  ;;  %1408 = vmatmul.bf16.vlgmr.msrb.gmra.mxu2 %v3626_v42  ;;  %v2387_v26 = vor.u32 %v2983_v19, %v2386_v18  ;;  %v2943_v45 = vld [vmem:[%s4515_s1 + $0x214] sm:$0xf0]  ;;  %v2196_v18 = vld [vmem:[%s4515_s1 + $0x1d8] sm:$0xf0]  ;;  %v2071_v19 = vor.u32 %v2901_v9, %v2068_v10  ;;  %v2546_v27 = vld [vmem:[%s4515_s1 + $0x488] sm:$0xf]  ;;  %v2055_v31 = vor.u32 %v2897_v21, %v2052_v22 }
  0x6c   :  { %1470 = vmatpush.bf16.msra.mxu2 %v2467_v23  ;;  %v2259_v23 = vor.u32 %v2951_v16, %v2258_v15  ;;  %v2975_v48 = vld [vmem:[%s4515_s1 + $0x314] sm:$0xf0]  ;;  %v2227_v59 = vor.u32 %v2943_v45, %v2226_v44  ;;  %v2562_v15 = vld [vmem:[%s4515_s1 + $0x4a8] sm:$0xf]  ;;  %v2036_v34 = vld [vmem:[%s4515_s1 + $0x98] sm:$0xf0] }
  0x6d   :  { %1458 = vmatpush.bf16.msrb.mxu0 %v2307_v46  ;;  %v2354_v46 = vld [vmem:[%s4515_s1 + $0x308] sm:$0xf]  ;;  %v3071_v51 = vld [vmem:[%s4515_s1 + $0x614] sm:$0xf0]  ;;  %v2164_v44 = vld [vmem:[%s4515_s1 + $0x198] sm:$0xf0]  ;;  %v2039_v45 = vor.u32 %v2893_v33, %v2036_v34 }
  0x6e   :  { %1430 = vmatpush.bf16.msrb.mxu1 %v2051_v43  ;;  %v2098_v43 = vld [vmem:[%s4515_s1 + $0x108] sm:$0xf]  ;;  %v2355_v0 = vor.u32 %v2975_v48, %v2354_v46  ;;  %v3027_v16 = vld [vmem:[%s4515_s1 + $0x4b4] sm:$0xf0]  ;;  %v2020_v48 = vld [vmem:[%s4515_s1 + $0x78] sm:$0xf0] }
  0x6f   :  { %1443 = vmatpush.bf16.msra.mxu3 %v2195_v39  ;;  %v2594_v39 = vld [vmem:[%s4515_s1 + $0x4e8] sm:$0xf]  ;;  %v3023_v28 = vld [vmem:[%s4515_s1 + $0x494] sm:$0xf0]  ;;  %v2132_v9 = vld [vmem:[%s4515_s1 + $0x158] sm:$0xf0] }
  0x70   :  { %1471 = vmatpush.bf16.msra.mxu2 %v2451_v35  ;;  %v1970_v35 = vld [vmem:[%s4515_s1 + $0x8] sm:$0xf]  ;;  %v3015_v57 = vld [vmem:[%s4515_s1 + $0x454] sm:$0xf0]  ;;  %v2116_v21 = vld [vmem:[%s4515_s1 + $0x138] sm:$0xf0] }
  0x71   :  { %1459 = vmatpush.bf16.msrb.mxu0 %v2291_v62  ;;  %v1971_v52 = vor.u32 %v2879_v38, %v1970_v35  ;;  %v3067_v62 = vld [vmem:[%s4515_s1 + $0x5f4] sm:$0xf0]  ;;  %v2547_v35 = vor.u32 %v3023_v28, %v2546_v27  ;;  %v2674_v38 = vld [vmem:[%s4515_s1 + $0x588] sm:$0xf]  ;;  %v2877_v27 = vld [vmem:[%s4515_s1 + $0xc] sm:$0xf] }
  0x72   :  { %1431 = vmatpush.bf16.msrb.mxu1 %v2035_v58  ;;  %v2595_v58 = vor.u32 %v3035_v40, %v2594_v39  ;;  %v3055_v39 = vld [vmem:[%s4515_s1 + $0x594] sm:$0xf0]  ;;  %v2530_v40 = vld [vmem:[%s4515_s1 + $0x468] sm:$0xf]  ;;  %v1972_v28 = vld [vmem:[%s4515_s1 + $0x18] sm:$0xf0] }
  0x73   :  { %1444 = vmatpush.bf16.msra.mxu3 %v2179_v53  ;;  %v2911_v53 = vld [vmem:[%s4515_s1 + $0x114] sm:$0xf0]  ;;  %v2675_v46 = vor.u32 %v3055_v39, %v2674_v38  ;;  %v2514_v56 = vld [vmem:[%s4515_s1 + $0x448] sm:$0xf]  ;;  %v2468_v33 = vld [vmem:[%s4515_s1 + $0x3f8] sm:$0xf0]  ;;  %v1975_v39 = vor.u32 %v2877_v27, %v1972_v28 }
  0x74   :  { %1472 = vmatpush.bf16.msra.mxu2 %v2435_v49  ;;  %v2738_v49 = vld [vmem:[%s4515_s1 + $0x608] sm:$0xf]  ;;  %v2099_v5 = vor.u32 %v2911_v53, %v2098_v43  ;;  %v2925_v43 = vld [vmem:[%s4515_s1 + $0x18c] sm:$0xf]  ;;  %v3051_v53 = vld [vmem:[%s4515_s1 + $0x574] sm:$0xf0] }
  0x75   :  { %1460 = vmatpush.bf16.msrb.mxu0 %v2275_v11  ;;  %v2739_v2 = vor.u32 %v3071_v51, %v2738_v49  ;;  %v2167_v51 = vor.u32 %v2925_v43, %v2164_v44  ;;  %v2965_v38 = vld [vmem:[%s4515_s1 + $0x2cc] sm:$0xf]  ;;  %v2100_v43 = vld [vmem:[%s4515_s1 + $0x118] sm:$0xf0] }
  0x76   :  { %1432 = vmatpush.bf16.msrb.mxu1 %v2019_v7  ;;  %2745 = vmatmul.msk.bf16.vlgmr.msrb.gmra.mxu3 %vm1228_vm0, %v3518_v50  ;;  %v2723_v7 = vor.u32 %v3067_v62, %v2722_v61  ;;  %v2404_v27 = vld [vmem:[%s4515_s1 + $0x378] sm:$0xf0]  ;;  %v3017_v28 = vld [vmem:[%s4515_s1 + $0x46c] sm:$0xf] }
  0x77   :  { %1445 = vmatpush.bf16.msra.mxu3 %v2163_v4  ;;  %v2212_v4 = vld [vmem:[%s4515_s1 + $0x1f8] sm:$0xf0] }
  0x78   :  { %1473 = vmatpush.bf16.msra.mxu2 %v2419_v1  ;;  %v3031_v1 = vld [vmem:[%s4515_s1 + $0x4d4] sm:$0xf0]  ;;  %v2215_v12 = vor.u32 %v2937_v3, %v2212_v4  ;;  %v2642_v3 = vld [vmem:[%s4515_s1 + $0x548] sm:$0xf] }
  0x79   :  { %1461 = vmatpush.bf16.msrb.mxu0 %v2259_v23  ;;  %v2579_v11 = vor.u32 %v3031_v1, %v2578_v63  ;;  %v2563_v23 = vor.u32 %v3027_v16, %v2562_v15  ;;  %v2885_v63 = vld [vmem:[%s4515_s1 + $0x4c] sm:$0xf]  ;;  %v2515_v1 = vor.u32 %v3015_v57, %v2514_v56  ;;  %v3047_v4 = vld [vmem:[%s4515_s1 + $0x554] sm:$0xf0]  ;;  %v2626_v16 = vld [vmem:[%s4515_s1 + $0x528] sm:$0xf] }
  0x7a   :  { %1433 = vmatpush.bf16.msrb.mxu1 %v2003_v20  ;;  %v3029_v56 = vld [vmem:[%s4515_s1 + $0x4cc] sm:$0xf]  ;;  %v2580_v57 = vld [vmem:[%s4515_s1 + $0x4d8] sm:$0xf0] }
  0x7b   :  { %1446 = vmatpush.bf16.msra.mxu3 %v2147_v17  ;;  %v2933_v17 = vld [vmem:[%s4515_s1 + $0x1cc] sm:$0xf] }
  0x7c   :  { %1474 = vmatpush.bf16.msra.mxu2 %v2403_v14  ;;  %v3063_v14 = vld [vmem:[%s4515_s1 + $0x5d4] sm:$0xf0]  ;;  %v2199_v24 = vor.u32 %v2933_v17, %v2196_v18  ;;  %v2482_v18 = vld [vmem:[%s4515_s1 + $0x408] sm:$0xf] }
  0x7d   :  { %1462 = vmatpush.bf16.msrb.mxu0 %v2243_v36  ;;  %v2707_v20 = vor.u32 %v3063_v14, %v2706_v13  ;;  %v1988_v13 = vld [vmem:[%s4515_s1 + $0x38] sm:$0xf0]  ;;  %v3043_v17 = vld [vmem:[%s4515_s1 + $0x534] sm:$0xf0] }
  0x7e   :  { %1434 = vmatpush.bf16.msrb.mxu1 %v1987_v32 }
  0x7f   :  { %1447 = vmatpush.bf16.msra.mxu3 %v2131_v29  ;;  %v2929_v29 = vld [vmem:[%s4515_s1 + $0x1ac] sm:$0xf] }
  0x80   :  { %1475 = vmatpush.bf16.msra.mxu2 %v2387_v26  ;;  %v3059_v26 = vld [vmem:[%s4515_s1 + $0x5b4] sm:$0xf0]  ;;  %v2183_v36 = vor.u32 %v2929_v29, %v2180_v30 }
  0x81   :  { %1463 = vmatpush.bf16.msrb.mxu0 %v2227_v59  ;;  %v2691_v32 = vor.u32 %v3059_v26, %v2690_v25  ;;  %v2148_v59 = vld [vmem:[%s4515_s1 + $0x178] sm:$0xf0]  ;;  %v2627_v25 = vor.u32 %v3043_v17, %v2626_v16  ;;  %v2610_v26 = vld [vmem:[%s4515_s1 + $0x508] sm:$0xf]  ;;  %v3021_v17 = vld [vmem:[%s4515_s1 + $0x48c] sm:$0xf] }
  0x82   :  { %1435 = vmatpush.bf16.msrb.mxu1 %v1971_v52  ;;  %v2658_v52 = vld [vmem:[%s4515_s1 + $0x568] sm:$0xf] }
  0x83   :  { %1448 = vmatpush.bf16.msra.mxu3 %v2115_v47  ;;  %v2889_v47 = vld [vmem:[%s4515_s1 + $0x6c] sm:$0xf]  ;;  %v2659_v62 = vor.u32 %v3051_v53, %v2658_v52  ;;  %v2452_v53 = vld [vmem:[%s4515_s1 + $0x3d8] sm:$0xf0] }
  0x84   :  { %1476 = vmatpush.bf16.msra.mxu2 %v2371_v41  ;;  %1464 = vmatmul.bf16.vlgmr.msrb.gmra.mxu0 %v3389_v54  ;;  %v3019_v41 = vld [vmem:[%s4515_s1 + $0x474] sm:$0xf0]  ;;  %v2023_v61 = vor.u32 %v2889_v47, %v2020_v48 }
  0x85   :  { %1519 = vmatpush.bf16.msra.mxu0 %v2739_v2  ;;  %1436 = vmatmul.bf16.vlgmr.msrb.gmra.mxu1 %v3391_v55  ;;  %v2531_v49 = vor.u32 %v3019_v41, %v2530_v40  ;;  %v2324_v40 = vld [vmem:[%s4515_s1 + $0x2d8] sm:$0xf0]  ;;  %v2909_v41 = vld [vmem:[%s4515_s1 + $0x10c] sm:$0xf] }
  0x86   :  { %1484 = vmatpush.bf16.msra.mxu1 %v2595_v58  ;;  %v2921_v58 = vld [vmem:[%s4515_s1 + $0x16c] sm:$0xf]  ;;  %v2103_v52 = vor.u32 %v2909_v41, %v2100_v43  ;;  %v2516_v43 = vld [vmem:[%s4515_s1 + $0x458] sm:$0xf0] }
  0x87   :  { %1449 = vmatpush.bf16.msra.mxu3 %v2099_v5  ;;  %v2151_v2 = vor.u32 %v2921_v58, %v2148_v59  ;;  %v2498_v5 = vld [vmem:[%s4515_s1 + $0x428] sm:$0xf]  ;;  %v2961_v59 = vld [vmem:[%s4515_s1 + $0x2ac] sm:$0xf] }
  0x88   :  { %1477 = vmatpush.bf16.msra.mxu2 %v2355_v0  ;;  %v2004_v0 = vld [vmem:[%s4515_s1 + $0x58] sm:$0xf0]  ;;  %v3013_v41 = vld [vmem:[%s4515_s1 + $0x44c] sm:$0xf] }
  0x89   :  { %1540 = vmatpush.bf16.msrb.mxu0 %v2215_v12  ;;  %v2007_v10 = vor.u32 %v2885_v63, %v2004_v0  ;;  %v2881_v12 = vld [vmem:[%s4515_s1 + $0x2c] sm:$0xf]  ;;  %v2708_v63 = vld [vmem:[%s4515_s1 + $0x5d8] sm:$0xf0] }
  0x8a   :  { %1485 = vmatpush.bf16.msra.mxu1 %v2579_v11  ;;  %1450 = vmatmul.bf16.vlgmr.msra.gmra.mxu3 %v3427_v8  ;;  %v2643_v11 = vor.u32 %v3047_v4, %v2642_v3  ;;  %v1991_v22 = vor.u32 %v2881_v12, %v1988_v13  ;;  %v2436_v4 = vld [vmem:[%s4515_s1 + $0x3b8] sm:$0xf0] }
  0x8b   :  { %1498 = vmatpush.bf16.msrb.mxu3 %v2723_v7  ;;  %1478 = vmatmul.bf16.vlgmr.msra.gmra.mxu2 %v3402_v60  ;;  %v2917_v7 = vld [vmem:[%s4515_s1 + $0x14c] sm:$0xf]  ;;  %v2692_v12 = vld [vmem:[%s4515_s1 + $0x5b8] sm:$0xf0] }
  0x8c   :  { %1526 = vmatpush.bf16.msrb.mxu2 %v2087_v6  ;;  %v3011_v6 = vld [vmem:[%s4515_s1 + $0x434] sm:$0xf0]  ;;  %v2135_v15 = vor.u32 %v2917_v7, %v2132_v9  ;;  %v2957_v9 = vld [vmem:[%s4515_s1 + $0x28c] sm:$0xf] }
  0x8d   :  { %1541 = vmatpush.bf16.msrb.mxu0 %v2199_v24  ;;  %v2499_v14 = vor.u32 %v3011_v6, %v2498_v5  ;;  %v2340_v24 = vld [vmem:[%s4515_s1 + $0x2f8] sm:$0xf0]  ;;  %v3025_v5 = vld [vmem:[%s4515_s1 + $0x4ac] sm:$0xf] }
  0x8e   :  { %1486 = vmatpush.bf16.msra.mxu1 %v2563_v23  ;;  %v2969_v23 = vld [vmem:[%s4515_s1 + $0x2ec] sm:$0xf]  ;;  %v2564_v6 = vld [vmem:[%s4515_s1 + $0x4b8] sm:$0xf0] }
  0x8f   :  { %1499 = vmatpush.bf16.msrb.mxu3 %v2707_v20  ;;  %v2913_v20 = vld [vmem:[%s4515_s1 + $0x12c] sm:$0xf]  ;;  %v2343_v34 = vor.u32 %v2969_v23, %v2340_v24  ;;  %v2676_v23 = vld [vmem:[%s4515_s1 + $0x598] sm:$0xf0] }
  0x90   :  { %1527 = vmatpush.bf16.msrb.mxu2 %v2071_v19  ;;  %v3007_v19 = vld [vmem:[%s4515_s1 + $0x414] sm:$0xf0]  ;;  %v2119_v30 = vor.u32 %v2913_v20, %v2116_v21  ;;  %v2953_v20 = vld [vmem:[%s4515_s1 + $0x26c] sm:$0xf]  ;;  %v2276_v21 = vld [vmem:[%s4515_s1 + $0x278] sm:$0xf0] }
  0x91   :  { %1542 = vmatpush.bf16.msrb.mxu0 %v2183_v36  ;;  %v2483_v29 = vor.u32 %v3007_v19, %v2482_v18  ;;  %v2596_v36 = vld [vmem:[%s4515_s1 + $0x4f8] sm:$0xf0] }
  0x92   :  { %1487 = vmatpush.bf16.msra.mxu1 %v2547_v35  ;;  %v3033_v35 = vld [vmem:[%s4515_s1 + $0x4ec] sm:$0xf]  ;;  %v2548_v18 = vld [vmem:[%s4515_s1 + $0x498] sm:$0xf0] }
  0x93   :  { %1500 = vmatpush.bf16.msrb.mxu3 %v2691_v32  ;;  %v3001_v32 = vld [vmem:[%s4515_s1 + $0x3ec] sm:$0xf]  ;;  %v2599_v48 = vor.u32 %v3033_v35, %v2596_v36  ;;  %v2551_v24 = vor.u32 %v3021_v17, %v2548_v18  ;;  %v2612_v17 = vld [vmem:[%s4515_s1 + $0x518] sm:$0xf0] }
  0x94   :  { %1528 = vmatpush.bf16.msrb.mxu2 %v2055_v31  ;;  %2746 = vmatmul.msk.bf16.vlgmr.msra.gmra.mxu0 %vm1228_vm0, %v3518_v50  ;;  %v3039_v31 = vld [vmem:[%s4515_s1 + $0x514] sm:$0xf0]  ;;  %v2471_v47 = vor.u32 %v3001_v32, %v2468_v33  ;;  %v2260_v32 = vld [vmem:[%s4515_s1 + $0x258] sm:$0xf0]  ;;  %v3049_v33 = vld [vmem:[%s4515_s1 + $0x56c] sm:$0xf] }
  0x95   :  { %1543 = vmatpush.bf16.msrb.mxu0 %v2167_v51  ;;  %v2611_v44 = vor.u32 %v3039_v31, %v2610_v26  ;;  %v2327_v51 = vor.u32 %v2965_v38, %v2324_v40  ;;  %v2279_v26 = vor.u32 %v2953_v20, %v2276_v21  ;;  %v2949_v31 = vld [vmem:[%s4515_s1 + $0x24c] sm:$0xf]  ;;  %v2388_v40 = vld [vmem:[%s4515_s1 + $0x358] sm:$0xf0] }
  0x96   :  { %1488 = vmatpush.bf16.msra.mxu1 %v2531_v49  ;;  %v2997_v49 = vld [vmem:[%s4515_s1 + $0x3cc] sm:$0xf]  ;;  %v3079_v20 = vld [vmem:[%s4518_s3 + $0x38] sm:$0xff] }
  0x97   :  { %1501 = vmatpush.bf16.msrb.mxu3 %v2675_v46  ;;  %v2724_v46 = vld [vmem:[%s4515_s1 + $0x5f8] sm:$0xf0]  ;;  %v2455_v0 = vor.u32 %v2997_v49, %v2452_v53  ;;  %v2981_v38 = vld [vmem:[%s4515_s1 + $0x34c] sm:$0xf] }
  0x98   :  { %1529 = vmatpush.bf16.msrb.mxu2 %v2039_v45  ;;  %v3065_v45 = vld [vmem:[%s4515_s1 + $0x5ec] sm:$0xf]  ;;  %v2391_v49 = vor.u32 %v2981_v38, %v2388_v40 }
  0x99   :  { %1544 = vmatpush.bf16.msrb.mxu0 %v2151_v2  ;;  %v2727_v58 = vor.u32 %v3065_v45, %v2724_v46  ;;  %v2993_v2 = vld [vmem:[%s4515_s1 + $0x3ac] sm:$0xf]  ;;  %v2244_v46 = vld [vmem:[%s4515_s1 + $0x238] sm:$0xf0] }
  0x9a   :  { %1489 = vmatpush.bf16.msra.mxu1 %v2515_v1  ;;  %v2583_v1 = vor.u32 %v3029_v56, %v2580_v57  ;;  %v2439_v13 = vor.u32 %v2993_v2, %v2436_v4  ;;  %v2945_v45 = vld [vmem:[%s4515_s1 + $0x22c] sm:$0xf]  ;;  %v2372_v57 = vld [vmem:[%s4515_s1 + $0x338] sm:$0xf0] }
  0x9b   :  { %1502 = vmatpush.bf16.msrb.mxu3 %v2659_v62  ;;  %v3061_v62 = vld [vmem:[%s4515_s1 + $0x5cc] sm:$0xf]  ;;  %v2247_v56 = vor.u32 %v2945_v45, %v2244_v46  ;;  %v2628_v2 = vld [vmem:[%s4515_s1 + $0x538] sm:$0xf0]  ;;  %v3074_v46 = vld [vmem:[%s4518_s3 + $0x10] sm:$0xff] }
  0x9c   :  { %1530 = vmatpush.bf16.msrb.mxu2 %v2023_v61  ;;  %v2308_v61 = vld [vmem:[%s4515_s1 + $0x2b8] sm:$0xf0]  ;;  %v2711_v7 = vor.u32 %v3061_v62, %v2708_v63  ;;  %v2941_v63 = vld [vmem:[%s4515_s1 + $0x20c] sm:$0xf] }
  0x9d   :  { %1545 = vmatpush.bf16.msrb.mxu0 %v2135_v15  ;;  %v2311_v3 = vor.u32 %v2961_v59, %v2308_v61  ;;  %v2989_v15 = vld [vmem:[%s4515_s1 + $0x38c] sm:$0xf]  ;;  %v2500_v59 = vld [vmem:[%s4515_s1 + $0x438] sm:$0xf0] }
  0x9e   :  { %1490 = vmatpush.bf16.msra.mxu1 %v2499_v14  ;;  %v2567_v14 = vor.u32 %v3025_v5, %v2564_v6  ;;  %v2740_v4 = vld [vmem:[%s4515_s1 + $0x618] sm:$0xf0] }
  0x9f   :  { %1503 = vmatpush.bf16.msrb.mxu3 %v2643_v11  ;;  %v3057_v11 = vld [vmem:[%s4515_s1 + $0x5ac] sm:$0xf] }
  0xa0   :  { %1531 = vmatpush.bf16.msrb.mxu2 %v2007_v10  ;;  %v2292_v10 = vld [vmem:[%s4515_s1 + $0x298] sm:$0xf0]  ;;  %v2695_v19 = vor.u32 %v3057_v11, %v2692_v12 }
  0xa1   :  { %1546 = vmatpush.bf16.msrb.mxu0 %v2119_v30  ;;  %v2295_v16 = vor.u32 %v2957_v9, %v2292_v10  ;;  %v2973_v10 = vld [vmem:[%s4515_s1 + $0x30c] sm:$0xf]  ;;  %v2356_v11 = vld [vmem:[%s4515_s1 + $0x318] sm:$0xf0] }
  0xa2   :  { %1491 = vmatpush.bf16.msra.mxu1 %v2483_v29  ;;  %v2532_v29 = vld [vmem:[%s4515_s1 + $0x478] sm:$0xf0]  ;;  %v2359_v18 = vor.u32 %v2973_v10, %v2356_v11 }
  0xa3   :  { %1504 = vmatpush.bf16.msrb.mxu3 %v2627_v25  ;;  %v2985_v25 = vld [vmem:[%s4515_s1 + $0x36c] sm:$0xf]  ;;  %v2535_v36 = vor.u32 %v3017_v28, %v2532_v29 }
  0xa4   :  { %1532 = vmatpush.bf16.msrb.mxu2 %v1991_v22  ;;  %v3053_v22 = vld [vmem:[%s4515_s1 + $0x58c] sm:$0xf]  ;;  %v2407_v35 = vor.u32 %v2985_v25, %v2404_v27  ;;  %v1241_v53 = vpop.f32.mrf.mxu0  ;;  %v3078_v25 = vld [vmem:[%s4518_s3 + $0x30] sm:$0xff] }
  0xa5   :  { %1492 = vmatmul.bf16.vlgmr.msra.gmra.mxu1 %v3615_v37  ;;  %1547 = vmatpush.bf16.msrb.mxu0 %v2103_v52  ;;  %v2679_v30 = vor.u32 %v3053_v22, %v2676_v23  ;;  %v2977_v52 = vld [vmem:[%s4515_s1 + $0x32c] sm:$0xf] }
  0xa6   :  { %1554 = vmatpush.bf16.msrb.mxu1 %v2343_v34  ;;  %v2660_v34 = vld [vmem:[%s4515_s1 + $0x578] sm:$0xf0]  ;;  %v2375_v5 = vor.u32 %v2977_v52, %v2372_v57  ;;  %v3072_v57 = vld [vmem:[%s4518_s3] sm:$0xff] }
  0xa7   :  { %1505 = vmatpush.bf16.msrb.mxu3 %v2611_v44  ;;  %v2663_v44 = vor.u32 %v3049_v33, %v2660_v34  ;;  %v3076_v33 = vld [vmem:[%s4518_s3 + $0x20] sm:$0xff] }
  0xa8   :  { %1533 = vmatpush.bf16.msrb.mxu2 %v1975_v39  ;;  %1548 = vmatmul.bf16.vlgmr.msrb.gmra.mxu0 %v3427_v8  ;;  %v2263_v39 = vor.u32 %v2949_v31, %v2260_v32  ;;  %v1255_v61 = vpop.f32.mrf.mxu1 }
  0xa9   :  { %1596 = vmatpush.bf16.msra.mxu0 %v2727_v58  ;;  %v3009_v58 = vld [vmem:[%s4515_s1 + $0x42c] sm:$0xf] }
  0xaa   :  { %1555 = vmatpush.bf16.msrb.mxu1 %v2327_v51  ;;  %1506 = vmatmul.bf16.vlgmr.msrb.gmra.mxu3 %v3626_v42  ;;  %v2519_v51 = vor.u32 %v3013_v41, %v2516_v43  ;;  %v2503_v6 = vor.u32 %v3009_v58, %v2500_v59  ;;  %v3086_v41 = vld [vmem:[%s4518_s3 + $0x70] sm:$0xff] }
  0xab   :  { %1568 = vmatpush.bf16.msra.mxu3 %v2471_v47  ;;  %1534 = vmatmul.bf16.vlgmr.msrb.gmra.mxu2 %v3391_v55  ;;  %v2420_v55 = vld [vmem:[%s4515_s1 + $0x398] sm:$0xf0]  ;;  %v3045_v47 = vld [vmem:[%s4515_s1 + $0x54c] sm:$0xf] }
  0xac   :  { %1582 = vmatpush.bf16.msra.mxu2 %v2599_v48  ;;  %v2423_v8 = vor.u32 %v2989_v15, %v2420_v55  ;;  %v2644_v48 = vld [vmem:[%s4515_s1 + $0x558] sm:$0xf0]  ;;  %v3037_v55 = vld [vmem:[%s4515_s1 + $0x50c] sm:$0xf]  ;;  %v1243_v23 = vpop.f32.mrf.mxu0 }
  0xad   :  { %1597 = vmatpush.bf16.msra.mxu0 %v2711_v7  ;;  %v2647_v62 = vor.u32 %v3045_v47, %v2644_v48  ;;  %v1269_v7 = vpop.f32.mrf.mxu2  ;;  %v2615_v22 = vor.u32 %v3037_v55, %v2612_v17  ;;  %v3085_v48 = vld [vmem:[%s4518_s3 + $0x68] sm:$0xff] }
  0xae   :  { %1556 = vmatpush.bf16.msrb.mxu1 %v2311_v3  ;;  %v3069_v3 = vld [vmem:[%s4515_s1 + $0x60c] sm:$0xf] }
  0xaf   :  { %1569 = vmatpush.bf16.msra.mxu3 %v2455_v0  ;;  %v2228_v0 = vld [vmem:[%s4515_s1 + $0x218] sm:$0xf0]  ;;  %v2743_v15 = vor.u32 %v3069_v3, %v2740_v4  ;;  %v3080_v4 = vld [vmem:[%s4518_s3 + $0x40] sm:$0xff] }
  0xb0   :  { %1583 = vmatpush.bf16.msra.mxu2 %v2583_v1  ;;  %v3041_v1 = vld [vmem:[%s4515_s1 + $0x52c] sm:$0xf]  ;;  %v2231_v9 = vor.u32 %v2941_v63, %v2228_v0  ;;  %v3082_v0 = vld [vmem:[%s4518_s3 + $0x50] sm:$0xff] }
  0xb1   :  { %1598 = vmatpush.bf16.msra.mxu0 %v2695_v19  ;;  %v2631_v12 = vor.u32 %v3041_v1, %v2628_v2  ;;  %v3081_v1 = vld [vmem:[%s4518_s3 + $0x48] sm:$0xff] }
  0xb2   :  { %1557 = vmatpush.bf16.msrb.mxu1 %v2295_v16  ;;  %v4395_v16 = vld [vmem:[%s4517_s2] sm:$0xf] }
  0xb3   :  { %1570 = vmatpush.bf16.msra.mxu3 %v2439_v13  ;;  %v3005_v13 = vld [vmem:[%s4515_s1 + $0x40c] sm:$0xf]  ;;  %v240_v21 = vperm.slane %v4395_v16, 0 }
  0xb4   :  { %1584 = vmatpush.bf16.msra.mxu2 %v2567_v14  ;;  %v2484_v14 = vld [vmem:[%s4515_s1 + $0x418] sm:$0xf0] }
  0xb5   :  { %1599 = vmatpush.bf16.msra.mxu0 %v2679_v30  ;;  %v2487_v19 = vor.u32 %v3005_v13, %v2484_v14  ;;  %v1244_v27 = vadd.f32 %v1243_v23, %v240_v21  ;;  %v1271_v28 = vpop.f32.mrf.mxu2  ;;  %v3094_v23 = vld [vmem:[%s4518_s3 + $0xb0] sm:$0xff] }
  0xb6   :  { %1558 = vmatpush.bf16.msrb.mxu1 %v2279_v26  ;;  %v1242_v26 = vadd.f32 %v1241_v53, %v240_v21  ;;  %v3084_v53 = vld [vmem:[%s4518_s3 + $0x60] sm:$0xff] }
  0xb7   :  { %1571 = vmatpush.bf16.msra.mxu3 %v2423_v8  ;;  %v1257_v8 = vpop.f32.mrf.mxu1 }
  0xb8   :  { %1585 = vmatpush.bf16.msra.mxu2 %v2551_v24  ;;  %v1283_v24 = vpop.f32.mrf.mxu3  ;;  %v1256_v29 = vadd.f32 %v1255_v61, %v1242_v26  ;;  %v1258_v30 = vadd.f32 %v1257_v8, %v1244_v27  ;;  %v3083_v61 = vld [vmem:[%s4518_s3 + $0x58] sm:$0xff] }
  0xb9   :  { %1600 = vmatpush.bf16.msra.mxu0 %v2663_v44 }
  0xba   :  { %1559 = vmatpush.bf16.msrb.mxu1 %v2263_v39  ;;  %v1270_v34 = vadd.f32 %v1269_v7, %v1256_v29  ;;  %v241_v7 = vperm.slane %v4395_v16, 1 }
  0xbb   :  { %1572 = vmatpush.bf16.msra.mxu3 %v2407_v35 }
  0xbc   :  { %1586 = vmatpush.bf16.msra.mxu2 %v2535_v36  ;;  %v3075_v36 = vld [vmem:[%s4518_s3 + $0x18] sm:$0xff]  ;;  %v1284_v38 = vadd.f32 %v1283_v24, %v1270_v34 }
  0xbd   :  { %1601 = vmatpush.bf16.msra.mxu0 %v2647_v62 }
  0xbe   :  { %1560 = vmatpush.bf16.msrb.mxu1 %v2247_v56 }
  0xbf   :  { %1573 = vmatpush.bf16.msra.mxu3 %v2391_v49 }
  0xc0   :  { %1587 = vmatpush.bf16.msra.mxu2 %v2519_v51  ;;  %v1285_v35 = vpop.f32.mrf.mxu3 }
  0xc1   :  { %1602 = vmatpush.bf16.msra.mxu0 %v2631_v12  ;;  %v1297_v31 = vpop.f32.mrf.mxu0 }
  0xc2   :  { %1561 = vmatpush.bf16.msrb.mxu1 %v2231_v9  ;;  %v1311_v32 = vpop.f32.mrf.mxu1  ;;  %v1298_v43 = vadd.f32 %v1297_v31, %v1284_v38  ;;  %v3092_v31 = vld [vmem:[%s4518_s3 + $0xa0] sm:$0xff] }
  0xc3   :  { %1574 = vmatpush.bf16.msra.mxu3 %v2375_v5 }
  0xc4   :  { %1588 = vmatpush.bf16.msra.mxu2 %v2503_v6  ;;  %v1312_v49 = vadd.f32 %v1311_v32, %v1298_v43 }
  0xc5   :  { %1562 = vmatmul.bf16.vlgmr.msrb.gmra.mxu1 %v3389_v54  ;;  %1603 = vmatpush.bf16.msra.mxu0 %v2615_v22  ;;  %v3077_v54 = vld [vmem:[%s4518_s3 + $0x28] sm:$0xff] }
  0xc6   :  { %1617 = vmatpush.bf16.msra.mxu1 %v2743_v15 }
  0xc7   :  { %1575 = vmatpush.bf16.msra.mxu3 %v2359_v18 }
  0xc8   :  { %1589 = vmatpush.bf16.msra.mxu2 %v2487_v19  ;;  %1604 = vmatmul.bf16.vlgmr.msra.gmra.mxu0 %v3626_v42  ;;  %v3087_v42 = vld [vmem:[%s4518_s3 + $0x78] sm:$0xff] }
  0xc9   :  { %v1299_v40 = vpop.f32.mrf.mxu0  ;;  %v1339_v59 = vpop.f32.mrf.mxu3 }
  0xca   :  { %1576 = vmatmul.bf16.vlgmr.msra.gmra.mxu3 %v3402_v60  ;;  %v1272_v60 = vadd.f32 %v1271_v28, %v1258_v30  ;;  %1910 = vmatpush.bf16.msrb.mxu1 %v3087_v42  ;;  %v1313_v45 = vpop.f32.mrf.mxu1  ;;  %v1340_v11 = vadd.f32 %v1339_v59, %v241_v7 }
  0xcb   :  { %1896 = vmatpush.bf16.msrb.mxu3 %v3079_v20  ;;  %1590 = vmatmul.bf16.vlgmr.msra.gmra.mxu2 %v3615_v37  ;;  %v1325_v37 = vpop.f32.mrf.mxu2  ;;  %v3095_v20 = vld [vmem:[%s4518_s3 + $0xb8] sm:$0xff] }
  0xcc   :  { %v1286_v39 = vadd.f32 %v1285_v35, %v1272_v60  ;;  %v1326_v56 = vadd.f32 %v1325_v37, %v1312_v49  ;;  %1924 = vmatpush.bf16.msrb.mxu2 %v3095_v20  ;;  %v3091_v37 = vld [vmem:[%s4518_s3 + $0x98] sm:$0xff] }
  0xce   :  { %v1300_v44 = vadd.f32 %v1299_v40, %v1286_v39  ;;  %1911 = vmatpush.bf16.msrb.mxu1 %v3086_v41  ;;  %v1624_v62 = vmax.f32 %v1326_v56, 0.0  ;;  %v3089_v39 = vld [vmem:[%s4518_s3 + $0x88] sm:$0xff]  ;;  %v3088_v40 = vld [vmem:[%s4518_s3 + $0x80] sm:$0xff] }
  0xcf   :  { %1897 = vmatpush.bf16.msrb.mxu3 %v3078_v25 }
  0xd0   :  { %v1314_v47 = vadd.f32 %v1313_v45, %v1300_v44  ;;  %1925 = vmatpush.bf16.msrb.mxu2 %v3094_v23  ;;  %v242_v44 = vperm.slane %v4395_v16, 2 }
  0xd1   :  { %v1341_v3 = vpop.f32.mrf.mxu3 }
  0xd2   :  { %1912 = vmatpush.bf16.msrb.mxu1 %v3085_v48  ;;  %v1342_v12 = vadd.f32 %v1341_v3, %v241_v7  ;;  %v3102_v48 = vld [vmem:[%s4518_s3 + $0xf0] sm:$0xff] }
  0xd3   :  { %1898 = vmatpush.bf16.msrb.mxu3 %v3077_v54  ;;  %v1327_v51 = vpop.f32.mrf.mxu2  ;;  %v3093_v54 = vld [vmem:[%s4518_s3 + $0xa8] sm:$0xff] }
  0xd4   :  { %v1328_v52 = vadd.f32 %v1327_v51, %v1314_v47  ;;  %1926 = vmatpush.bf16.msrb.mxu2 %v3093_v54 }
  0xd5   :  { %2747 = vmatmul.msk.bf16.vlgmr.msra.gmra.mxu1 %vm1228_vm0, %v3518_v50  ;;  %v3073_v50 = vld [vmem:[%s4518_s3 + $0x8] sm:$0xff] }
  0xd6   :  { %1913 = vmatpush.bf16.msrb.mxu1 %v3084_v53  ;;  %v1628_v58 = vmax.f32 %v1328_v52, 0.0 }
  0xd7   :  { %1899 = vmatpush.bf16.msrb.mxu3 %v3076_v33 }
  0xd8   :  { %v1632_v63 = vpack.c.bf16 %v1628_v58, %v1624_v62  ;;  %1927 = vmatpush.bf16.msrb.mxu2 %v3092_v31 }
  0xda   :  { %1914 = vmatpush.bf16.msrb.mxu1 %v3083_v61  ;;  %v3100_v61 = vld [vmem:[%s4518_s3 + $0xe0] sm:$0xff] }
  0xdb   :  { %1900 = vmatpush.bf16.msrb.mxu3 %v3075_v36  ;;  %v1353_v2 = vpop.f32.mrf.mxu2  ;;  %v3090_v36 = vld [vmem:[%s4518_s3 + $0x90] sm:$0xff] }
  0xdc   :  { %v1354_v14 = vadd.f32 %v1353_v2, %v1340_v11  ;;  %1928 = vmatpush.bf16.msrb.mxu2 %v3091_v37 }
  0xde   :  { %1915 = vmatpush.bf16.msrb.mxu1 %v3082_v0 }
  0xdf   :  { %1901 = vmatpush.bf16.msrb.mxu3 %v3074_v46  ;;  %v3103_v46 = vld [vmem:[%s4518_s3 + $0xf8] sm:$0xff] }
  0xe0   :  { %1929 = vmatpush.bf16.msrb.mxu2 %v3090_v36  ;;  %1938 = vmatpush.bf16.msrb.mxu0 %v3103_v46 }
  0xe1   :  { %v1367_v5 = vpop.f32.mrf.mxu0 }
  0xe2   :  { %1916 = vmatpush.bf16.msrb.mxu1 %v3081_v1  ;;  %v1381_v10 = vpop.f32.mrf.mxu1  ;;  %v1368_v18 = vadd.f32 %v1367_v5, %v1354_v14 }
  0xe3   :  { %1902 = vmatpush.bf16.msrb.mxu3 %v3073_v50  ;;  %v1355_v9 = vpop.f32.mrf.mxu2 }
  0xe4   :  { %v1356_v17 = vadd.f32 %v1355_v9, %v1342_v12  ;;  %v1382_v22 = vadd.f32 %v1381_v10, %v1368_v18  ;;  %1930 = vmatpush.bf16.msrb.mxu2 %v3089_v39  ;;  %1939 = vmatpush.bf16.msrb.mxu0 %v3102_v48  ;;  %v3098_v10 = vld [vmem:[%s4518_s3 + $0xd0] sm:$0xff] }
  0xe6   :  { %1917 = vmatpush.bf16.msrb.mxu1 %v3080_v4  ;;  %v3099_v4 = vld [vmem:[%s4518_s3 + $0xd8] sm:$0xff] }
  0xe7   :  { %1903 = vmatpush.bf16.msrb.mxu3 %v3072_v57  ;;  %v3101_v57 = vld [vmem:[%s4518_s3 + $0xe8] sm:$0xff] }
  0xe8   :  { %1931 = vmatpush.bf16.msrb.mxu2 %v3088_v40  ;;  %1940 = vmatpush.bf16.msrb.mxu0 %v3101_v57 }
  0xe9   :  { %v1395_v6 = vpop.f32.mrf.mxu3  ;;  %v1369_v15 = vpop.f32.mrf.mxu0 }
  0xea   :  { %1904 = vmatmul.bf16.vlgmr.msrb.gmra.mxu3 %v1632_v63  ;;  %v1370_v19 = vadd.f32 %v1369_v15, %v1356_v17  ;;  %v1383_v21 = vpop.f32.mrf.mxu1  ;;  %v1396_v24 = vadd.f32 %v1395_v6, %v1382_v22  ;;  %v243_v22 = vperm.slane %v4395_v16, 3 }
  0xec   :  { %v1384_v25 = vadd.f32 %v1383_v21, %v1370_v19  ;;  %1941 = vmatpush.bf16.msrb.mxu0 %v3100_v61  ;;  %v3096_v21 = vld [vmem:[%s4518_s3 + $0xc0] sm:$0xff] }
  0xee   :  { %v1409_v55 = vpop.f32.mrf.mxu2 }
  0xef   :  { %v1410_v28 = vadd.f32 %v1409_v55, %v1396_v24  ;;  %v3097_v55 = vld [vmem:[%s4518_s3 + $0xc8] sm:$0xff] }
  0xf0   :  { %1942 = vmatpush.bf16.msrb.mxu0 %v3099_v4 }
  0xf1   :  { %v1397_v13 = vpop.f32.mrf.mxu3 }
  0xf2   :  { %v1398_v26 = vadd.f32 %v1397_v13, %v1384_v25 }
  0xf4   :  { %1943 = vmatpush.bf16.msrb.mxu0 %v3098_v10 }
  0xf6   :  { %v1411_v27 = vpop.f32.mrf.mxu2 }
  0xf7   :  { %v1412_v29 = vadd.f32 %v1411_v27, %v1398_v26 }
  0xf8   :  { %1944 = vmatpush.bf16.msrb.mxu0 %v3097_v55 }
  0xf9   :  { %v1423_v8 = vpop.f32.mrf.mxu3 }
  0xfa   :  { %v1424_v30 = vadd.f32 %v1423_v8, %v1410_v28 }
  0xfc   :  { %v1625_v34 = vmax.f32 %v1424_v30, 0.0  ;;  %1945 = vmatpush.bf16.msrb.mxu0 %v3096_v21 }
 0x101   :  { %v1425_v32 = vpop.f32.mrf.mxu3  ;;  %v1465_v42 = vpop.f32.mrf.mxu0 }
 0x102   :  { %v1426_v33 = vadd.f32 %v1425_v32, %v1412_v29  ;;  %v1437_v38 = vpop.f32.mrf.mxu1 }
 0x103   :  { %v1438_v47 = vadd.f32 %v1437_v38, %v242_v44 }
 0x104   :  { %v1629_v60 = vmax.f32 %v1426_v33, 0.0 }
 0x106   :  { %v1633_v35 = vpack.c.bf16 %v1629_v60, %v1625_v34 }
 0x108   :  { %1918 = vmatmul.bf16.vlgmr.msrb.gmra.mxu1 %v1633_v35 }
 0x109   :  { %v1467_v43 = vpop.f32.mrf.mxu0 }
 0x10a   :  { %v1439_v45 = vpop.f32.mrf.mxu1 }
 0x10b   :  { %v1440_v53 = vadd.f32 %v1439_v45, %v242_v44 }
 0x10d   :  { %v1451_v41 = vpop.f32.mrf.mxu3 }
 0x10e   :  { %v1479_v51 = vpop.f32.mrf.mxu2  ;;  %v1452_v52 = vadd.f32 %v1451_v41, %v1438_v47 }
 0x110   :  { %v1466_v58 = vadd.f32 %v1465_v42, %v1452_v52 }
 0x111   :  { %v1521_v49 = vpop.f32.mrf.mxu0 }
 0x112   :  { %v1480_v63 = vadd.f32 %v1479_v51, %v1466_v58 }
 0x115   :  { %v1453_v50 = vpop.f32.mrf.mxu3 }
 0x116   :  { %v1454_v59 = vadd.f32 %v1453_v50, %v1440_v53  ;;  %v1481_v2 = vpop.f32.mrf.mxu2  ;;  %v3109_v50 = vld [vmem:[%s4519_s4] ss:$0 sm:$0xff] }
 0x118   :  { %v1468_v0 = vadd.f32 %v1467_v43, %v1454_v59 }
 0x119   :  { %v1523_v1 = vpop.f32.mrf.mxu0 }
 0x11a   :  { %v1482_v6 = vadd.f32 %v1481_v2, %v1468_v0 }
 0x122   :  { %v1493_v56 = vpop.f32.mrf.mxu1 }
 0x123   :  { %v1494_v3 = vadd.f32 %v1493_v56, %v1480_v63 }
 0x125   :  { %v1549_v15 = vpop.f32.mrf.mxu0 }
 0x12a   :  { %v1495_v5 = vpop.f32.mrf.mxu1 }
 0x12b   :  { %v1496_v9 = vadd.f32 %v1495_v5, %v1482_v6 }
 0x12d   :  { %v1507_v62 = vpop.f32.mrf.mxu3  ;;  %v1551_v24 = vpop.f32.mrf.mxu0 }
 0x12e   :  { %v1508_v7 = vadd.f32 %v1507_v62, %v1494_v3  ;;  %v1535_v17 = vpop.f32.mrf.mxu2 }
 0x12f   :  { %v1536_v8 = vadd.f32 %v1535_v17, %v243_v22 }
 0x130   :  { %v1522_v12 = vadd.f32 %v1521_v49, %v1508_v7 }
 0x131   :  { %v1550_v26 = vadd.f32 %v1549_v15, %v1536_v8 }
 0x132   :  { %v1626_v18 = vmax.f32 %v1522_v12, 0.0 }
 0x135   :  { %v1509_v11 = vpop.f32.mrf.mxu3 }
 0x136   :  { %v1510_v13 = vadd.f32 %v1509_v11, %v1496_v9  ;;  %v1537_v25 = vpop.f32.mrf.mxu2 }
 0x137   :  { %v1538_v29 = vadd.f32 %v1537_v25, %v243_v22 }
 0x138   :  { %v1524_v14 = vadd.f32 %v1523_v1, %v1510_v13 }
 0x139   :  { %v1552_v33 = vadd.f32 %v1551_v24, %v1538_v29 }
 0x13a   :  { %v1630_v19 = vmax.f32 %v1524_v14, 0.0 }
 0x13c   :  { %v1634_v20 = vpack.c.bf16 %v1630_v19, %v1626_v18 }
 0x13e   :  { %1932 = vmatmul.bf16.vlgmr.msrb.gmra.mxu2 %v1634_v20 }
 0x142   :  { %v1563_v23 = vpop.f32.mrf.mxu1 }
 0x143   :  { %v1564_v28 = vadd.f32 %v1563_v23, %v1550_v26 }
 0x145   :  { %v1605_v31 = vpop.f32.mrf.mxu0 }
 0x14a   :  { %v1565_v27 = vpop.f32.mrf.mxu1 }
 0x14b   :  { %v1566_v60 = vadd.f32 %v1565_v27, %v1552_v33 }
 0x14d   :  { %v1577_v54 = vpop.f32.mrf.mxu3  ;;  %v1607_v39 = vpop.f32.mrf.mxu0 }
 0x14e   :  { %v1591_v30 = vpop.f32.mrf.mxu2  ;;  %v1578_v32 = vadd.f32 %v1577_v54, %v1564_v28 }
 0x150   :  { %v1592_v34 = vadd.f32 %v1591_v30, %v1578_v32 }
 0x152   :  { %v1619_v35 = vpop.f32.mrf.mxu1  ;;  %v1606_v42 = vadd.f32 %v1605_v31, %v1592_v34 }
 0x154   :  { %v1620_v41 = vadd.f32 %v1619_v35, %v1606_v42 }
 0x155   :  { %v1579_v37 = vpop.f32.mrf.mxu3 }
 0x156   :  { %v1580_v16 = vadd.f32 %v1579_v37, %v1566_v60  ;;  %v1593_v36 = vpop.f32.mrf.mxu2  ;;  %v1627_v45 = vmax.f32 %v1620_v41, 0.0 }
 0x158   :  { %v1594_v38 = vadd.f32 %v1593_v36, %v1580_v16 }
 0x15a   :  { %v1608_v40 = vadd.f32 %v1607_v39, %v1594_v38  ;;  %v1621_v43 = vpop.f32.mrf.mxu1 }
 0x15c   :  { %v1622_v44 = vadd.f32 %v1621_v43, %v1608_v40 }
 0x15e   :  { %v1631_v46 = vmax.f32 %v1622_v44, 0.0 }
 0x160   :  { %v1635_v47 = vpack.c.bf16 %v1631_v46, %v1627_v45 }
 0x162   :  { %1946 = vmatmul.bf16.vlgmr.msrb.gmra.mxu0 %v1635_v47 }
 0x16d   :  { %v1905_v48 = vpop.f32.mrf.mxu3 }
 0x16e   :  { %v1906_v57 = vadd.f32 %v3109_v50, %v1905_v48 }
 0x175   :  { %v1907_v52 = vpop.f32.mrf.mxu3 }
 0x176   :  { %v1908_v58 = vadd.f32 %v3109_v50, %v1907_v52 }
 0x185   :  { %v1919_v49 = vpop.f32.mrf.mxu1 }
 0x186   :  { %v1920_v61 = vadd.f32 %v1919_v49, %v1906_v57 }
 0x18d   :  { %v1921_v56 = vpop.f32.mrf.mxu1 }
 0x18e   :  { %v1922_v62 = vadd.f32 %v1921_v56, %v1908_v58 }
 0x1c1   :  { %v1933_v51 = vpop.f32.mrf.mxu2 }
 0x1c2   :  { %v1934_v63 = vadd.f32 %v1933_v51, %v1920_v61 }
 0x1c9   :  { %v1935_v59 = vpop.f32.mrf.mxu2 }
 0x1ca   :  { %v1936_v0 = vadd.f32 %v1935_v59, %v1922_v62 }
 0x1df   :  { %v1947_v53 = vpop.f32.mrf.mxu0 }
 0x1e0   :  { %v1948_v2 = vadd.f32 %v1947_v53, %v1934_v63 }
 0x1e7   :  { %v1949_v1 = vpop.f32.mrf.mxu0 }
 0x1e8   :  { %v1950_v3 = vadd.f32 %v1949_v1, %v1936_v0 }
 0x1ea   :  { %v3107_v4 = vpack.c.bf16 %v1950_v3, %v1948_v2 }
 0x1ec   :  { %3108 = vst [vmem:[%s4520_s5] sm:$0xff] %v3107_v4  }

</bundles_post_ra>
